<compile_context>
chip_gen: v6e
topology: v6e:2x2x1
jax: 0.10.0
libtpu: 0.0.40
codegen_flags: <defaults>
</compile_context>

<pallas_src>
import functools
import re

import jax
import jax.numpy as jnp
from jax.experimental import pallas as pl
from jax.experimental.pallas import tpu as pltpu


# --------------------------------------------------------------------------
# Kernel
# --------------------------------------------------------------------------
def mlp_kernel(*refs, num_layers, add_residual):
    """refs = (x_ref, w0..w{L-1}, b0..b{L-1}, o_ref).

    Weights are pre-transposed to (in, out) and padded lane-dense by the
    wrapper; biases are f32 (1, out_padded). `add_residual` is a static tuple
    of bools derived from the original, unpadded layer sizes.
    """
    x_ref = refs[0]
    w_refs = refs[1:1 + num_layers]
    b_refs = refs[1 + num_layers:1 + 2 * num_layers]
    o_ref = refs[-1]

    compute_dtype = w_refs[0].dtype

    # Bias add / residual path stays in f32; only MXU operands use compute_dtype.
    h = x_ref[...].astype(jnp.float32)
    for l in range(num_layers):                       # static layer loop
        y = jnp.dot(h.astype(compute_dtype), w_refs[l][...],
                    preferred_element_type=jnp.float32)
        y = y + b_refs[l][...]                        # f32 bias broadcast over rows
        h = h + y if add_residual[l] else y
    o_ref[...] = h.astype(o_ref.dtype)


# --------------------------------------------------------------------------
# Helpers
# --------------------------------------------------------------------------
def _round_up(x, m):
    return ((x + m - 1) // m) * m


def _tpu_info():
    """Returns (physical VMEM bytes per core, tensorcores per chip, generation)."""
    gen = 6
    try:
        kind = jax.devices()[0].device_kind
        m = re.search(r"v(\d+)", kind.lower())
        if m:
            gen = int(m.group(1))
    except Exception:
        pass
    vmem_bytes = None
    try:
        info = pltpu.get_tpu_info()
        vmem_bytes = int(getattr(info, "vmem_capacity_bytes"))
    except Exception:
        vmem_bytes = None
    if not vmem_bytes or vmem_bytes <= 0:
        vmem_bytes = (64 << 20) if gen >= 7 else (128 << 20)
    cores_per_chip = 2 if gen >= 7 else 1
    return vmem_bytes, cores_per_chip, gen


def _pick_batch_tiling(batch, row_align, cores_per_chip, max_tile_rows):
    """Return (padded_batch, batch_tile, grid_steps).

    - 1-TC chips / small B: single grid step (no artificial splitting).
    - Large B: tiles sized by VMEM (<= max_tile_rows).
    - v7x-class (2 TC) with B >= 512: even number of steps, per-core tile >= 256.
    """
    b_al = _round_up(batch, row_align)
    max_tile_rows = max(row_align, (max_tile_rows // row_align) * row_align)
    want_megacore = cores_per_chip >= 2 and b_al >= 512
    if b_al <= max_tile_rows and not want_megacore:
        return b_al, b_al, 1
    n = max(1, -(-b_al // max_tile_rows))            # ceil
    if want_megacore:
        n = max(n, 2)
        if n % 2:
            n += 1
        while n > 2 and _round_up(-(-b_al // n), row_align) < 256:
            n -= 2
    tb = _round_up(-(-b_al // n), row_align)
    return tb * n, tb, n


# --------------------------------------------------------------------------
# Prepared module: weight preprocessing hoisted out of the per-call path
# --------------------------------------------------------------------------
class PreparedExampleDNN:
    def __init__(self, weights, biases, *, use_shortcut,
                 compute_dtype=jnp.float32, out_dtype=jnp.float32):
        self.num_layers = len(weights)
        self.dims = [weights[0].shape[1]] + [w.shape[0] for w in weights]
        for l, w in enumerate(weights):
            assert w.shape == (self.dims[l + 1], self.dims[l])
        # Residual decision from ORIGINAL dims (padding would always match).
        self.add_residual = tuple(
            bool(use_shortcut and self.dims[l] == self.dims[l + 1])
            for l in range(self.num_layers))
        self.compute_dtype = jnp.dtype(compute_dtype)
        self.out_dtype = jnp.dtype(out_dtype)

        self.vmem_bytes, self.cores_per_chip, self.gen = _tpu_info()

        # Feature padding: lane-dense (128); wide layers on v6e/v7x -> 256 (MXU fill).
        big_align = 256 if self.gen >= 6 else 128
        self.pdims = [_round_up(d, big_align if d >= 512 else 128)
                      for d in self.dims]

        cb = self.compute_dtype.itemsize
        self.w_padded, self.b_padded = [], []
        for l in range(self.num_layers):
            w_t = jnp.pad(
                weights[l].T,
                ((0, self.pdims[l] - self.dims[l]),
                 (0, self.pdims[l + 1] - self.dims[l + 1]))).astype(self.compute_dtype)
            b_p = jnp.pad(biases[l], (0, self.pdims[l + 1] - self.dims[l + 1])
                          ).reshape(1, -1).astype(jnp.float32)
            self.w_padded.append(w_t)
            self.b_padded.append(b_p)

        # Resident (single-buffered) parameter footprint in VMEM.
        self.param_bytes = sum(
            self.pdims[l] * self.pdims[l + 1] * cb + self.pdims[l + 1] * 4
            for l in range(self.num_layers))

        # Generation-aware VMEM cap: ~78% of physical with 8 MiB headroom
        # (~100 MiB on v5e/v6e, ~50 MiB on v7x).
        self.vmem_cap = int(min(self.vmem_bytes - (8 << 20),
                                (self.vmem_bytes * 25) // 32))
        # TODO(synk): if the combined padded weights ever exceed the VMEM cap,
        # switch weights to memory_space=pl.ANY and double-buffer them per layer
        # with pltpu.make_async_copy so layer l+1's weight DMA overlaps layer l's
        # matmul (also the only way to run layer sets larger than v7x's 64 MiB).

        self._call_cache = {}

    def __call__(self, x):
        B, d_in = x.shape
        assert d_in == self.dims[0]
        cb = self.compute_dtype.itemsize
        ob = self.out_dtype.itemsize
        row_align = 16 if cb < 4 else 8   # bf16 packs 16 rows per sublane group

        # How many batch rows fit next to the resident weights.
        per_row = (2 * (self.pdims[0] * cb + self.pdims[-1] * ob)   # x/out dbl-buffers
                   + 3 * max(self.pdims) * 4)                       # f32 temporaries
        avail = self.vmem_cap - self.param_bytes - (4 << 20)
        max_tile_rows = max(row_align, min(2048, avail // per_row))

        B_pad, tb, nsteps = _pick_batch_tiling(B, row_align, self.cores_per_chip,
                                               max_tile_rows)

        # NOTE: in the bf16 path x is cast here, so layer-0's residual uses
        # bf16-rounded activations (slightly beyond pure MXU-operand rounding).
        x_p = jnp.pad(x, ((0, B_pad - B), (0, self.pdims[0] - d_in))
                      ).astype(self.compute_dtype)

        vmem_needed = (self.param_bytes
                       + 2 * tb * (self.pdims[0] * cb + self.pdims[-1] * ob)
                       + 3 * tb * max(self.pdims) * 4
                       + (2 << 20))
        vmem_limit = int(min(self.vmem_cap, max(vmem_needed, 16 << 20)))

        flops = 2 * B_pad * sum(self.pdims[l] * self.pdims[l + 1]
                                for l in range(self.num_layers))
        bytes_accessed = (B_pad * self.pdims[0] * cb
                          + B_pad * self.pdims[-1] * ob
                          + self.param_bytes)
        cost = pl.CostEstimate(flops=int(flops), transcendentals=0,
                               bytes_accessed=int(bytes_accessed))

        kernel = functools.partial(mlp_kernel, num_layers=self.num_layers,
                                   add_residual=self.add_residual)

        def build(single_buffer_params):
            def param_spec(shape):
                if single_buffer_params:
                    # Grid-invariant blocks: single-buffer (halves their VMEM).
                    return pl.BlockSpec(shape, lambda i: (0, 0),
                                        pipeline_mode=pl.Buffered(1))
                return pl.BlockSpec(shape, lambda i: (0, 0))

            in_specs = [pl.BlockSpec((tb, self.pdims[0]), lambda i: (i, 0))]
            in_specs += [param_spec((self.pdims[l], self.pdims[l + 1]))
                         for l in range(self.num_layers)]
            in_specs += [param_spec((1, self.pdims[l + 1]))
                         for l in range(self.num_layers)]
            out_specs = pl.BlockSpec((tb, self.pdims[-1]), lambda i: (i, 0))

            return pl.pallas_call(
                kernel,
                out_shape=jax.ShapeDtypeStruct((B_pad, self.pdims[-1]),
                                               self.out_dtype),
                grid=(nsteps,),
                in_specs=in_specs,
                out_specs=out_specs,
                compiler_params=pltpu.CompilerParams(
                    dimension_semantics=("parallel",),
                    vmem_limit_bytes=vmem_limit),
                cost_estimate=cost,
            )

        key = (B_pad, tb, nsteps)
        fn = self._call_cache.get(key)
        if fn is not None:
            out_padded = fn(x_p, *self.w_padded, *self.b_padded)
        else:
            try:
                fn = build(True)
                out_padded = fn(x_p, *self.w_padded, *self.b_padded)
            except Exception:
                fn = build(False)   # known-good default double-buffered specs
                out_padded = fn(x_p, *self.w_padded, *self.b_padded)
            self._call_cache[key] = fn

        return out_padded[:B, :self.dims[-1]]


# --------------------------------------------------------------------------
# Init + reference (PyTorch-Linear-style)
# --------------------------------------------------------------------------
def init_params(key, layer_sizes):
    """PyTorch Linear init: U(-1/sqrt(fan_in), 1/sqrt(fan_in)), (out, in) layout."""
    weights, biases = [], []
    for l in range(len(layer_sizes) - 1):
        fan_in, fan_out = layer_sizes[l], layer_sizes[l + 1]
        key, kw, kb = jax.random.split(key, 3)
        bound = 1.0 / jnp.sqrt(jnp.float32(fan_in))
        weights.append(jax.random.uniform(kw, (fan_out, fan_in), jnp.float32,
                                          -bound, bound))
        biases.append(jax.random.uniform(kb, (fan_out,), jnp.float32,
                                         -bound, bound))
    return weights, biases


def reference_forward(x, weights, biases, use_shortcut):
    h = x
    for w, b in zip(weights, biases):
        y = h @ w.T + b
        if use_shortcut and h.shape == y.shape:
            h = h + y
        else:
            h = y
    return h


# --------------------------------------------------------------------------
# Test
# --------------------------------------------------------------------------
if __name__ == "__main__":
    # 6 layer sizes -> 5 Linear layers; mixed sizes exercise both the
    # shortcut branch (in == out) and the plain branch (in != out).
    layer_sizes = [32, 32, 32, 64, 64, 32]
    use_shortcut = True
    batch = 64

    key = jax.random.PRNGKey(0)
    key, kx = jax.random.split(key)
    x = jax.random.normal(kx, (batch, layer_sizes[0]), jnp.float32)
    weights, biases = init_params(key, layer_sizes)

    ref = reference_forward(x, weights, biases, use_shortcut)

    # Exact f32 MXU path (weights prepared once, reused across calls).
    mlp_f32 = PreparedExampleDNN(weights, biases, use_shortcut=use_shortcut,
                                 compute_dtype=jnp.float32)
    out_f32 = jax.block_until_ready(mlp_f32(x))
    assert out_f32.shape == (batch, layer_sizes[-1])
    assert jnp.allclose(out_f32, ref, atol=5e-4, rtol=5e-4), "f32 mismatch vs reference"
    # Second call reuses the cached pallas_call (no weight re-prep / re-trace).
    out_f32b = jax.block_until_ready(mlp_f32(x))
    assert jnp.allclose(out_f32b, out_f32), "cached-call mismatch"

    # bf16 fast MXU path: bf16 operands, f32 accumulation/bias/residual.
    mlp_bf16 = PreparedExampleDNN(weights, biases, use_shortcut=use_shortcut,
                                  compute_dtype=jnp.bfloat16)
    out_bf16 = jax.block_until_ready(mlp_bf16(x))
    assert out_bf16.shape == (batch, layer_sizes[-1])
    assert jnp.allclose(out_bf16, ref, atol=1e-1, rtol=1e-1), "bf16 mismatch vs reference"

    print("KERNEL_OK")
</pallas_src>

<mosaic_0001>
module attributes {stable_mosaic.version = 11 : i64} {
  func.func @mlp_kernel(%arg0: i32, %arg1: memref<64x128xf32, #tpu.memory_space<vmem>>, %arg2: memref<128x128xf32, #tpu.memory_space<vmem>>, %arg3: memref<128x128xf32, #tpu.memory_space<vmem>>, %arg4: memref<128x128xf32, #tpu.memory_space<vmem>>, %arg5: memref<128x128xf32, #tpu.memory_space<vmem>>, %arg6: memref<128x128xf32, #tpu.memory_space<vmem>>, %arg7: memref<1x128xf32, #tpu.memory_space<vmem>>, %arg8: memref<1x128xf32, #tpu.memory_space<vmem>>, %arg9: memref<1x128xf32, #tpu.memory_space<vmem>>, %arg10: memref<1x128xf32, #tpu.memory_space<vmem>>, %arg11: memref<1x128xf32, #tpu.memory_space<vmem>>, %arg12: memref<64x128xf32, #tpu.memory_space<vmem>>) attributes {dimension_semantics = [#tpu.dimension_semantics<parallel>], iteration_bounds = array<i64: 1>, scalar_prefetch = 0 : i64, scratch_operands = 0 : i64, tpu.core_type = #tpu.core_type<tc>, window_params = [{transform_indices = @transform_0, window_bounds = array<i64: 64, 128>}, {pipeline_mode = #tpu.pipeline_mode<synchronous>, transform_indices = @transform_1, window_bounds = array<i64: 128, 128>}, {pipeline_mode = #tpu.pipeline_mode<synchronous>, transform_indices = @transform_2, window_bounds = array<i64: 128, 128>}, {pipeline_mode = #tpu.pipeline_mode<synchronous>, transform_indices = @transform_3, window_bounds = array<i64: 128, 128>}, {pipeline_mode = #tpu.pipeline_mode<synchronous>, transform_indices = @transform_4, window_bounds = array<i64: 128, 128>}, {pipeline_mode = #tpu.pipeline_mode<synchronous>, transform_indices = @transform_5, window_bounds = array<i64: 128, 128>}, {pipeline_mode = #tpu.pipeline_mode<synchronous>, transform_indices = @transform_6, window_bounds = array<i64: 1, 128>}, {pipeline_mode = #tpu.pipeline_mode<synchronous>, transform_indices = @transform_7, window_bounds = array<i64: 1, 128>}, {pipeline_mode = #tpu.pipeline_mode<synchronous>, transform_indices = @transform_8, window_bounds = array<i64: 1, 128>}, {pipeline_mode = #tpu.pipeline_mode<synchronous>, transform_indices = @transform_9, window_bounds = array<i64: 1, 128>}, {pipeline_mode = #tpu.pipeline_mode<synchronous>, transform_indices = @transform_10, window_bounds = array<i64: 1, 128>}, {transform_indices = @transform_11, window_bounds = array<i64: 64, 128>}]} {
    %c0 = arith.constant 0 : index
    %c0_0 = arith.constant 0 : index
    %0 = vector.load %arg1[%c0, %c0_0] : memref<64x128xf32, #tpu.memory_space<vmem>>, vector<64x128xf32>
    %c0_1 = arith.constant 0 : index
    %c0_2 = arith.constant 0 : index
    %1 = vector.load %arg2[%c0_1, %c0_2] : memref<128x128xf32, #tpu.memory_space<vmem>>, vector<128x128xf32>
    %cst = arith.constant dense<0.000000e+00> : vector<64x128xf32>
    %2 = tpu.matmul %0, %1, %cst {dimension_numbers = #tpu.dot_dimension_numbers<[1], [0], [0], [1], [0, 0, 1, 1], [], []>} : vector<64x128xf32>, vector<128x128xf32>, vector<64x128xf32> -> vector<64x128xf32>
    %c0_3 = arith.constant 0 : index
    %c0_4 = arith.constant 0 : index
    %3 = vector.load %arg7[%c0_3, %c0_4] : memref<1x128xf32, #tpu.memory_space<vmem>>, vector<1x128xf32>
    %4 = vector.broadcast %3 : vector<1x128xf32> to vector<64x128xf32>
    %5 = arith.addf %2, %4 : vector<64x128xf32>
    %6 = arith.addf %0, %5 : vector<64x128xf32>
    %c0_5 = arith.constant 0 : index
    %c0_6 = arith.constant 0 : index
    %7 = vector.load %arg3[%c0_5, %c0_6] : memref<128x128xf32, #tpu.memory_space<vmem>>, vector<128x128xf32>
    %cst_7 = arith.constant dense<0.000000e+00> : vector<64x128xf32>
    %8 = tpu.matmul %6, %7, %cst_7 {dimension_numbers = #tpu.dot_dimension_numbers<[1], [0], [0], [1], [0, 0, 1, 1], [], []>} : vector<64x128xf32>, vector<128x128xf32>, vector<64x128xf32> -> vector<64x128xf32>
    %c0_8 = arith.constant 0 : index
    %c0_9 = arith.constant 0 : index
    %9 = vector.load %arg8[%c0_8, %c0_9] : memref<1x128xf32, #tpu.memory_space<vmem>>, vector<1x128xf32>
    %10 = vector.broadcast %9 : vector<1x128xf32> to vector<64x128xf32>
    %11 = arith.addf %8, %10 : vector<64x128xf32>
    %12 = arith.addf %6, %11 : vector<64x128xf32>
    %c0_10 = arith.constant 0 : index
    %c0_11 = arith.constant 0 : index
    %13 = vector.load %arg4[%c0_10, %c0_11] : memref<128x128xf32, #tpu.memory_space<vmem>>, vector<128x128xf32>
    %cst_12 = arith.constant dense<0.000000e+00> : vector<64x128xf32>
    %14 = tpu.matmul %12, %13, %cst_12 {dimension_numbers = #tpu.dot_dimension_numbers<[1], [0], [0], [1], [0, 0, 1, 1], [], []>} : vector<64x128xf32>, vector<128x128xf32>, vector<64x128xf32> -> vector<64x128xf32>
    %c0_13 = arith.constant 0 : index
    %c0_14 = arith.constant 0 : index
    %15 = vector.load %arg9[%c0_13, %c0_14] : memref<1x128xf32, #tpu.memory_space<vmem>>, vector<1x128xf32>
    %16 = vector.broadcast %15 : vector<1x128xf32> to vector<64x128xf32>
    %17 = arith.addf %14, %16 : vector<64x128xf32>
    %c0_15 = arith.constant 0 : index
    %c0_16 = arith.constant 0 : index
    %18 = vector.load %arg5[%c0_15, %c0_16] : memref<128x128xf32, #tpu.memory_space<vmem>>, vector<128x128xf32>
    %cst_17 = arith.constant dense<0.000000e+00> : vector<64x128xf32>
    %19 = tpu.matmul %17, %18, %cst_17 {dimension_numbers = #tpu.dot_dimension_numbers<[1], [0], [0], [1], [0, 0, 1, 1], [], []>} : vector<64x128xf32>, vector<128x128xf32>, vector<64x128xf32> -> vector<64x128xf32>
    %c0_18 = arith.constant 0 : index
    %c0_19 = arith.constant 0 : index
    %20 = vector.load %arg10[%c0_18, %c0_19] : memref<1x128xf32, #tpu.memory_space<vmem>>, vector<1x128xf32>
    %21 = vector.broadcast %20 : vector<1x128xf32> to vector<64x128xf32>
    %22 = arith.addf %19, %21 : vector<64x128xf32>
    %23 = arith.addf %17, %22 : vector<64x128xf32>
    %c0_20 = arith.constant 0 : index
    %c0_21 = arith.constant 0 : index
    %24 = vector.load %arg6[%c0_20, %c0_21] : memref<128x128xf32, #tpu.memory_space<vmem>>, vector<128x128xf32>
    %cst_22 = arith.constant dense<0.000000e+00> : vector<64x128xf32>
    %25 = tpu.matmul %23, %24, %cst_22 {dimension_numbers = #tpu.dot_dimension_numbers<[1], [0], [0], [1], [0, 0, 1, 1], [], []>} : vector<64x128xf32>, vector<128x128xf32>, vector<64x128xf32> -> vector<64x128xf32>
    %c0_23 = arith.constant 0 : index
    %c0_24 = arith.constant 0 : index
    %26 = vector.load %arg11[%c0_23, %c0_24] : memref<1x128xf32, #tpu.memory_space<vmem>>, vector<1x128xf32>
    %27 = vector.broadcast %26 : vector<1x128xf32> to vector<64x128xf32>
    %28 = arith.addf %25, %27 : vector<64x128xf32>
    %c0_25 = arith.constant 0 : index
    %c0_26 = arith.constant 0 : index
    %29 = vector.load %arg12[%c0_25, %c0_26] : memref<64x128xf32, #tpu.memory_space<vmem>>, vector<64x128xf32>
    tpu.vector_store %arg12[%c0_25, %c0_26], %28 {strides = array<i32>} : memref<64x128xf32, #tpu.memory_space<vmem>>, vector<64x128xf32>,
    return
  }
  func.func @transform_0(%arg0: i32) -> (i32, i32) {
    %c0_i32 = arith.constant 0 : i32
    %c0_i32_0 = arith.constant 0 : i32
    return %arg0, %c0_i32 : i32, i32
  }
  func.func @transform_1(%arg0: i32) -> (i32, i32) {
    %c0_i32 = arith.constant 0 : i32
    %c0_i32_0 = arith.constant 0 : i32
    %c0_i32_1 = arith.constant 0 : i32
    return %c0_i32, %c0_i32_0 : i32, i32
  }
  func.func @transform_2(%arg0: i32) -> (i32, i32) {
    %c0_i32 = arith.constant 0 : i32
    %c0_i32_0 = arith.constant 0 : i32
    %c0_i32_1 = arith.constant 0 : i32
    return %c0_i32, %c0_i32_0 : i32, i32
  }
  func.func @transform_3(%arg0: i32) -> (i32, i32) {
    %c0_i32 = arith.constant 0 : i32
    %c0_i32_0 = arith.constant 0 : i32
    %c0_i32_1 = arith.constant 0 : i32
    return %c0_i32, %c0_i32_0 : i32, i32
  }
  func.func @transform_4(%arg0: i32) -> (i32, i32) {
    %c0_i32 = arith.constant 0 : i32
    %c0_i32_0 = arith.constant 0 : i32
    %c0_i32_1 = arith.constant 0 : i32
    return %c0_i32, %c0_i32_0 : i32, i32
  }
  func.func @transform_5(%arg0: i32) -> (i32, i32) {
    %c0_i32 = arith.constant 0 : i32
    %c0_i32_0 = arith.constant 0 : i32
    %c0_i32_1 = arith.constant 0 : i32
    return %c0_i32, %c0_i32_0 : i32, i32
  }
  func.func @transform_6(%arg0: i32) -> (i32, i32) {
    %c0_i32 = arith.constant 0 : i32
    %c0_i32_0 = arith.constant 0 : i32
    %c0_i32_1 = arith.constant 0 : i32
    return %c0_i32, %c0_i32_0 : i32, i32
  }
  func.func @transform_7(%arg0: i32) -> (i32, i32) {
    %c0_i32 = arith.constant 0 : i32
    %c0_i32_0 = arith.constant 0 : i32
    %c0_i32_1 = arith.constant 0 : i32
    return %c0_i32, %c0_i32_0 : i32, i32
  }
  func.func @transform_8(%arg0: i32) -> (i32, i32) {
    %c0_i32 = arith.constant 0 : i32
    %c0_i32_0 = arith.constant 0 : i32
    %c0_i32_1 = arith.constant 0 : i32
    return %c0_i32, %c0_i32_0 : i32, i32
  }
  func.func @transform_9(%arg0: i32) -> (i32, i32) {
    %c0_i32 = arith.constant 0 : i32
    %c0_i32_0 = arith.constant 0 : i32
    %c0_i32_1 = arith.constant 0 : i32
    return %c0_i32, %c0_i32_0 : i32, i32
  }
  func.func @transform_10(%arg0: i32) -> (i32, i32) {
    %c0_i32 = arith.constant 0 : i32
    %c0_i32_0 = arith.constant 0 : i32
    %c0_i32_1 = arith.constant 0 : i32
    return %c0_i32, %c0_i32_0 : i32, i32
  }
  func.func @transform_11(%arg0: i32) -> (i32, i32) {
    %c0_i32 = arith.constant 0 : i32
    %c0_i32_0 = arith.constant 0 : i32
    return %arg0, %c0_i32 : i32, i32
  }
}

module attributes {stable_mosaic.version = 11 : i64} {
  func.func @mlp_kernel(%arg0: i32, %arg1: memref<64x128xf32, #tpu.memory_space<vmem>>, %arg2: memref<128x128xf32, #tpu.memory_space<vmem>>, %arg3: memref<128x128xf32, #tpu.memory_space<vmem>>, %arg4: memref<128x128xf32, #tpu.memory_space<vmem>>, %arg5: memref<128x128xf32, #tpu.memory_space<vmem>>, %arg6: memref<128x128xf32, #tpu.memory_space<vmem>>, %arg7: memref<1x128xf32, #tpu.memory_space<vmem>>, %arg8: memref<1x128xf32, #tpu.memory_space<vmem>>, %arg9: memref<1x128xf32, #tpu.memory_space<vmem>>, %arg10: memref<1x128xf32, #tpu.memory_space<vmem>>, %arg11: memref<1x128xf32, #tpu.memory_space<vmem>>, %arg12: memref<64x128xf32, #tpu.memory_space<vmem>>) attributes {dimension_semantics = [#tpu.dimension_semantics<parallel>], iteration_bounds = array<i64: 1>, scalar_prefetch = 0 : i64, scratch_operands = 0 : i64, tpu.core_type = #tpu.core_type<tc>, window_params = [{transform_indices = @transform_0, window_bounds = array<i64: 64, 128>}, {pipeline_mode = #tpu.pipeline_mode<synchronous>, transform_indices = @transform_1, window_bounds = array<i64: 128, 128>}, {pipeline_mode = #tpu.pipeline_mode<synchronous>, transform_indices = @transform_2, window_bounds = array<i64: 128, 128>}, {pipeline_mode = #tpu.pipeline_mode<synchronous>, transform_indices = @transform_3, window_bounds = array<i64: 128, 128>}, {pipeline_mode = #tpu.pipeline_mode<synchronous>, transform_indices = @transform_4, window_bounds = array<i64: 128, 128>}, {pipeline_mode = #tpu.pipeline_mode<synchronous>, transform_indices = @transform_5, window_bounds = array<i64: 128, 128>}, {pipeline_mode = #tpu.pipeline_mode<synchronous>, transform_indices = @transform_6, window_bounds = array<i64: 1, 128>}, {pipeline_mode = #tpu.pipeline_mode<synchronous>, transform_indices = @transform_7, window_bounds = array<i64: 1, 128>}, {pipeline_mode = #tpu.pipeline_mode<synchronous>, transform_indices = @transform_8, window_bounds = array<i64: 1, 128>}, {pipeline_mode = #tpu.pipeline_mode<synchronous>, transform_indices = @transform_9, window_bounds = array<i64: 1, 128>}, {pipeline_mode = #tpu.pipeline_mode<synchronous>, transform_indices = @transform_10, window_bounds = array<i64: 1, 128>}, {transform_indices = @transform_11, window_bounds = array<i64: 64, 128>}]} {
    %c0 = arith.constant 0 : index
    %c0_0 = arith.constant 0 : index
    %0 = vector.load %arg1[%c0, %c0_0] : memref<64x128xf32, #tpu.memory_space<vmem>>, vector<64x128xf32>
    %c0_1 = arith.constant 0 : index
    %c0_2 = arith.constant 0 : index
    %1 = vector.load %arg2[%c0_1, %c0_2] : memref<128x128xf32, #tpu.memory_space<vmem>>, vector<128x128xf32>
    %cst = arith.constant dense<0.000000e+00> : vector<64x128xf32>
    %2 = tpu.matmul %0, %1, %cst {dimension_numbers = #tpu.dot_dimension_numbers<[1], [0], [0], [1], [0, 0, 1, 1], [], []>} : vector<64x128xf32>, vector<128x128xf32>, vector<64x128xf32> -> vector<64x128xf32>
    %c0_3 = arith.constant 0 : index
    %c0_4 = arith.constant 0 : index
    %3 = vector.load %arg7[%c0_3, %c0_4] : memref<1x128xf32, #tpu.memory_space<vmem>>, vector<1x128xf32>
    %4 = vector.broadcast %3 : vector<1x128xf32> to vector<64x128xf32>
    %5 = arith.addf %2, %4 : vector<64x128xf32>
    %6 = arith.addf %0, %5 : vector<64x128xf32>
    %c0_5 = arith.constant 0 : index
    %c0_6 = arith.constant 0 : index
    %7 = vector.load %arg3[%c0_5, %c0_6] : memref<128x128xf32, #tpu.memory_space<vmem>>, vector<128x128xf32>
    %cst_7 = arith.constant dense<0.000000e+00> : vector<64x128xf32>
    %8 = tpu.matmul %6, %7, %cst_7 {dimension_numbers = #tpu.dot_dimension_numbers<[1], [0], [0], [1], [0, 0, 1, 1], [], []>} : vector<64x128xf32>, vector<128x128xf32>, vector<64x128xf32> -> vector<64x128xf32>
    %c0_8 = arith.constant 0 : index
    %c0_9 = arith.constant 0 : index
    %9 = vector.load %arg8[%c0_8, %c0_9] : memref<1x128xf32, #tpu.memory_space<vmem>>, vector<1x128xf32>
    %10 = vector.broadcast %9 : vector<1x128xf32> to vector<64x128xf32>
    %11 = arith.addf %8, %10 : vector<64x128xf32>
    %12 = arith.addf %6, %11 : vector<64x128xf32>
    %c0_10 = arith.constant 0 : index
    %c0_11 = arith.constant 0 : index
    %13 = vector.load %arg4[%c0_10, %c0_11] : memref<128x128xf32, #tpu.memory_space<vmem>>, vector<128x128xf32>
    %cst_12 = arith.constant dense<0.000000e+00> : vector<64x128xf32>
    %14 = tpu.matmul %12, %13, %cst_12 {dimension_numbers = #tpu.dot_dimension_numbers<[1], [0], [0], [1], [0, 0, 1, 1], [], []>} : vector<64x128xf32>, vector<128x128xf32>, vector<64x128xf32> -> vector<64x128xf32>
    %c0_13 = arith.constant 0 : index
    %c0_14 = arith.constant 0 : index
    %15 = vector.load %arg9[%c0_13, %c0_14] : memref<1x128xf32, #tpu.memory_space<vmem>>, vector<1x128xf32>
    %16 = vector.broadcast %15 : vector<1x128xf32> to vector<64x128xf32>
    %17 = arith.addf %14, %16 : vector<64x128xf32>
    %c0_15 = arith.constant 0 : index
    %c0_16 = arith.constant 0 : index
    %18 = vector.load %arg5[%c0_15, %c0_16] : memref<128x128xf32, #tpu.memory_space<vmem>>, vector<128x128xf32>
    %cst_17 = arith.constant dense<0.000000e+00> : vector<64x128xf32>
    %19 = tpu.matmul %17, %18, %cst_17 {dimension_numbers = #tpu.dot_dimension_numbers<[1], [0], [0], [1], [0, 0, 1, 1], [], []>} : vector<64x128xf32>, vector<128x128xf32>, vector<64x128xf32> -> vector<64x128xf32>
    %c0_18 = arith.constant 0 : index
    %c0_19 = arith.constant 0 : index
    %20 = vector.load %arg10[%c0_18, %c0_19] : memref<1x128xf32, #tpu.memory_space<vmem>>, vector<1x128xf32>
    %21 = vector.broadcast %20 : vector<1x128xf32> to vector<64x128xf32>
    %22 = arith.addf %19, %21 : vector<64x128xf32>
    %23 = arith.addf %17, %22 : vector<64x128xf32>
    %c0_20 = arith.constant 0 : index
    %c0_21 = arith.constant 0 : index
    %24 = vector.load %arg6[%c0_20, %c0_21] : memref<128x128xf32, #tpu.memory_space<vmem>>, vector<128x128xf32>
    %cst_22 = arith.constant dense<0.000000e+00> : vector<64x128xf32>
    %25 = tpu.matmul %23, %24, %cst_22 {dimension_numbers = #tpu.dot_dimension_numbers<[1], [0], [0], [1], [0, 0, 1, 1], [], []>} : vector<64x128xf32>, vector<128x128xf32>, vector<64x128xf32> -> vector<64x128xf32>
    %c0_23 = arith.constant 0 : index
    %c0_24 = arith.constant 0 : index
    %26 = vector.load %arg11[%c0_23, %c0_24] : memref<1x128xf32, #tpu.memory_space<vmem>>, vector<1x128xf32>
    %27 = vector.broadcast %26 : vector<1x128xf32> to vector<64x128xf32>
    %28 = arith.addf %25, %27 : vector<64x128xf32>
    %c0_25 = arith.constant 0 : index
    %c0_26 = arith.constant 0 : index
    %29 = vector.load %arg12[%c0_25, %c0_26] : memref<64x128xf32, #tpu.memory_space<vmem>>, vector<64x128xf32>
    tpu.vector_store %arg12[%c0_25, %c0_26], %28 {strides = array<i32>} : memref<64x128xf32, #tpu.memory_space<vmem>>, vector<64x128xf32>,
    return
  }
  func.func @transform_0(%arg0: i32) -> (i32, i32) {
    %c0_i32 = arith.constant 0 : i32
    %c0_i32_0 = arith.constant 0 : i32
    return %arg0, %c0_i32 : i32, i32
  }
  func.func @transform_1(%arg0: i32) -> (i32, i32) {
    %c0_i32 = arith.constant 0 : i32
    %c0_i32_0 = arith.constant 0 : i32
    %c0_i32_1 = arith.constant 0 : i32
    return %c0_i32, %c0_i32_0 : i32, i32
  }
  func.func @transform_2(%arg0: i32) -> (i32, i32) {
    %c0_i32 = arith.constant 0 : i32
    %c0_i32_0 = arith.constant 0 : i32
    %c0_i32_1 = arith.constant 0 : i32
    return %c0_i32, %c0_i32_0 : i32, i32
  }
  func.func @transform_3(%arg0: i32) -> (i32, i32) {
    %c0_i32 = arith.constant 0 : i32
    %c0_i32_0 = arith.constant 0 : i32
    %c0_i32_1 = arith.constant 0 : i32
    return %c0_i32, %c0_i32_0 : i32, i32
  }
  func.func @transform_4(%arg0: i32) -> (i32, i32) {
    %c0_i32 = arith.constant 0 : i32
    %c0_i32_0 = arith.constant 0 : i32
    %c0_i32_1 = arith.constant 0 : i32
    return %c0_i32, %c0_i32_0 : i32, i32
  }
  func.func @transform_5(%arg0: i32) -> (i32, i32) {
    %c0_i32 = arith.constant 0 : i32
    %c0_i32_0 = arith.constant 0 : i32
    %c0_i32_1 = arith.constant 0 : i32
    return %c0_i32, %c0_i32_0 : i32, i32
  }
  func.func @transform_6(%arg0: i32) -> (i32, i32) {
    %c0_i32 = arith.constant 0 : i32
    %c0_i32_0 = arith.constant 0 : i32
    %c0_i32_1 = arith.constant 0 : i32
    return %c0_i32, %c0_i32_0 : i32, i32
  }
  func.func @transform_7(%arg0: i32) -> (i32, i32) {
    %c0_i32 = arith.constant 0 : i32
    %c0_i32_0 = arith.constant 0 : i32
    %c0_i32_1 = arith.constant 0 : i32
    return %c0_i32, %c0_i32_0 : i32, i32
  }
  func.func @transform_8(%arg0: i32) -> (i32, i32) {
    %c0_i32 = arith.constant 0 : i32
    %c0_i32_0 = arith.constant 0 : i32
    %c0_i32_1 = arith.constant 0 : i32
    return %c0_i32, %c0_i32_0 : i32, i32
  }
  func.func @transform_9(%arg0: i32) -> (i32, i32) {
    %c0_i32 = arith.constant 0 : i32
    %c0_i32_0 = arith.constant 0 : i32
    %c0_i32_1 = arith.constant 0 : i32
    return %c0_i32, %c0_i32_0 : i32, i32
  }
  func.func @transform_10(%arg0: i32) -> (i32, i32) {
    %c0_i32 = arith.constant 0 : i32
    %c0_i32_0 = arith.constant 0 : i32
    %c0_i32_1 = arith.constant 0 : i32
    return %c0_i32, %c0_i32_0 : i32, i32
  }
  func.func @transform_11(%arg0: i32) -> (i32, i32) {
    %c0_i32 = arith.constant 0 : i32
    %c0_i32_0 = arith.constant 0 : i32
    return %arg0, %c0_i32 : i32, i32
  }
}

</mosaic_0001>

<bundles_post_ra>
// kernel: tpu_custom_call.1
= control target key start
LH: loop header
LB: loop body
LE: loop exit
PB: predicated region body
PF: predicated region fallthrough
CT: control target
= control target key end

     0   :  { %16 = vsyncpa [#allocation3], 0  ;;  %s1579_s0 = inlined_call_operand.hbm [shape: f32[64,128], index: 0, kind: input, shape index: {}]   ;;  %s1580_s1 = inlined_call_operand.hbm [shape: f32[128,128], index: 1, kind: input, shape index: {}]   ;;  %s1581_s2 = inlined_call_operand.hbm [shape: f32[128,128], index: 2, kind: input, shape index: {}]   ;;  %s1582_s3 = inlined_call_operand.hbm [shape: f32[128,128], index: 3, kind: input, shape index: {}]   ;;  %s1583_s4 = inlined_call_operand.hbm [shape: f32[128,128], index: 4, kind: input, shape index: {}]   ;;  %s1584_s5 = inlined_call_operand.hbm [shape: f32[128,128], index: 5, kind: input, shape index: {}]   ;;  %s1585_s6 = inlined_call_operand.vmem [shape: f32[1,128], index: 6, kind: input, shape index: {}]   ;;  %s1586_s7 = inlined_call_operand.vmem [shape: f32[1,128], index: 7, kind: input, shape index: {}]   ;;  %s1587_s8 = inlined_call_operand.vmem [shape: f32[1,128], index: 8, kind: input, shape index: {}]   ;;  %s1588_s9 = inlined_call_operand.vmem [shape: f32[1,128], index: 9, kind: input, shape index: {}]   ;;  %s1589_s10 = inlined_call_operand.vmem [shape: f32[1,128], index: 10, kind: input, shape index: {}]   ;;  %s1590_s11 = inlined_call_operand.hbm [shape: f32[64,128], index: 11, kind: output, shape index: {}]  }
   0x1   :  { %17 = vsyncpa [#allocation6], 0 }
   0x2   :  { %18 = vsyncpa [#allocation9], 0 }
   0x3   :  { %19 = vsyncpa [#allocation12], 0 }
   0x4   :  { %20 = vsyncpa [#allocation4], 0  ;;  %s1357_s17 = smov [#allocation5]   ;;  %s1358_s19 = smov [#allocation8]  }
   0x5   :  { %s38_s18 = sshll.u32 %s1357_s17, 4  ;;  %s62_s20 = sshll.u32 %s1358_s19, 4  ;;  %s39_s18 = int_to_ptr.vmem [resolvable:$true] %s38_s18  ;;  %s63_s20 = int_to_ptr.vmem [resolvable:$true] %s62_s20 }
   0x6   :  { %s1215_s21 = scalar_lea.vmem %s39_s18, 2048  ;;  %p1220_p1 = scmp.lt.s32.totalorder %s39_s18, %s39_s18 }
   0x7   :  { %p1216_p0 = scmp.ne.s32.totalorder %s39_s18, %s1215_s21  ;;  %p1221_p2 = scmp.lt.s32.totalorder %s1215_s21, %s1215_s21 }
   0x9   :  { %p1222_p3 = por %p1221_p2, %p1220_p1 }
   0xb   :  { %p1223_p4 = pnand %p1222_p3, %p1216_p0 }
   0xd   :  { %1226 = shalt.err (!%p1223_p4)
}
   0xe   :  { %s1359_s22 = smov 128   ;;  %s1360_s23 = smov 8  }
   0xf   :  { %44 = dma.hbm_to_vmem [thread:$0]  %s1580_s1, 2048, %s39_s18, [#allocation6], %s1359_s22, %s1359_s22, %s1360_s23  }
  0x10   :  { %s1235_s26 = scalar_lea.vmem %s63_s20, 2048  ;;  %p1240_p6 = scmp.lt.s32.totalorder %s63_s20, %s63_s20 }
  0x11   :  { %p1236_p5 = scmp.ne.s32.totalorder %s63_s20, %s1235_s26  ;;  %p1241_p7 = scmp.lt.s32.totalorder %s1235_s26, %s1235_s26 }
  0x13   :  { %p1242_p8 = por %p1241_p7, %p1240_p6 }
  0x15   :  { %p1243_p9 = pnand %p1242_p8, %p1236_p5 }
  0x17   :  { %1246 = shalt.err (!%p1243_p9)
}
  0x18   :  { %68 = dma.hbm_to_vmem [thread:$0]  %s1582_s3, 2048, %s63_s20, [#allocation9], %s1359_s22, %s1359_s22, %s1360_s23  }
  0x19   :  { %s1361_s29 = smov [#allocation2]   ;;  %s1362_s12 = smov [#allocation7]  }
  0x1a   :  { %s26_s30 = sshll.u32 %s1361_s29, 4  ;;  %s50_s13 = sshll.u32 %s1362_s12, 4  ;;  %s27_s30 = int_to_ptr.vmem [resolvable:$true] %s26_s30  ;;  %s51_s13 = int_to_ptr.vmem [resolvable:$true] %s50_s13 }
  0x1b   :  { %s1255_s1 = scalar_lea.vmem %s27_s30, 1024  ;;  %p1260_p11 = scmp.lt.s32.totalorder %s27_s30, %s27_s30 }
  0x1c   :  { %p1256_p10 = scmp.ne.s32.totalorder %s27_s30, %s1255_s1  ;;  %p1261_p12 = scmp.lt.s32.totalorder %s1255_s1, %s1255_s1 }
  0x1e   :  { %p1262_p13 = por %p1261_p12, %p1260_p11 }
  0x20   :  { %p1263_p0 = pnand %p1262_p13, %p1256_p10 }
  0x22   :  { %1266 = shalt.err (!%p1263_p0)
}
  0x23   :  { %32 = dma.hbm_to_vmem [thread:$0]  %s1579_s0, 1024, %s27_s30, [#allocation3], %s1359_s22, %s1359_s22, %s1360_s23  }
  0x24   :  { %s1275_s3 = scalar_lea.vmem %s51_s13, 2048  ;;  %p1280_p2 = scmp.lt.s32.totalorder %s51_s13, %s51_s13 }
  0x25   :  { %p1276_p1 = scmp.ne.s32.totalorder %s51_s13, %s1275_s3  ;;  %p1281_p3 = scmp.lt.s32.totalorder %s1275_s3, %s1275_s3 }
  0x27   :  { %p1282_p4 = por %p1281_p3, %p1280_p2 }
  0x29   :  { %p1283_p5 = pnand %p1282_p4, %p1276_p1 }
  0x2b   :  { %1286 = shalt.err (!%p1283_p5)
}
  0x2c   :  { %56 = dma.hbm_to_vmem [thread:$0]  %s1581_s2, 2048, %s51_s13, [#allocation6], %s1359_s22, %s1359_s22, %s1360_s23  }
  0x2d   :  { %s1363_s18 = smov [#allocation10]   ;;  %s1364_s20 = smov [#allocation11]  }
  0x2e   :  { %s74_s19 = sshll.u32 %s1363_s18, 4  ;;  %s86_s21 = sshll.u32 %s1364_s20, 4  ;;  %s75_s19 = int_to_ptr.vmem [resolvable:$true] %s74_s19  ;;  %s87_s21 = int_to_ptr.vmem [resolvable:$true] %s86_s21 }
  0x2f   :  { %s1295_s0 = scalar_lea.vmem %s75_s19, 2048  ;;  %p1300_p7 = scmp.lt.s32.totalorder %s75_s19, %s75_s19 }
  0x30   :  { %p1296_p6 = scmp.ne.s32.totalorder %s75_s19, %s1295_s0  ;;  %p1301_p8 = scmp.lt.s32.totalorder %s1295_s0, %s1295_s0 }
  0x32   :  { %p1302_p9 = por %p1301_p8, %p1300_p7 }
  0x34   :  { %p1303_p10 = pnand %p1302_p9, %p1296_p6 }
  0x36   :  { %1306 = shalt.err (!%p1303_p10)
}
  0x37   :  { %80 = dma.hbm_to_vmem [thread:$0]  %s1583_s4, 2048, %s75_s19, [#allocation9], %s1359_s22, %s1359_s22, %s1360_s23  }
  0x38   :  { %s1315_s2 = scalar_lea.vmem %s87_s21, 2048  ;;  %p1320_p12 = scmp.lt.s32.totalorder %s87_s21, %s87_s21 }
  0x39   :  { %p1316_p11 = scmp.ne.s32.totalorder %s87_s21, %s1315_s2  ;;  %p1321_p13 = scmp.lt.s32.totalorder %s1315_s2, %s1315_s2 }
  0x3b   :  { %p1322_p0 = por %p1321_p13, %p1320_p12 }
  0x3d   :  { %p1323_p1 = pnand %p1322_p0, %p1316_p11 }
  0x3f   :  { %1326 = shalt.err (!%p1323_p1)
}
  0x40   :  { %92 = dma.hbm_to_vmem [thread:$0]  %s1584_s5, 2048, %s87_s21, [#allocation12], %s1359_s22, %s1359_s22, %s1360_s23  }
  0x41   :  { %1347 = dma.done.wait [#allocation3], 1024  }
  0x42   :  { %1348 = vsyncadd [#allocation3], 4294966272 }
  0x43   :  { %1349 = dma.done.wait [#allocation6], 4096  }
  0x44   :  { %1350 = vsyncadd [#allocation6], 4294963200 }
  0x45   :  { %1351 = dma.done.wait [#allocation9], 4096  }
  0x46   :  { %1352 = vsyncadd [#allocation9], 4294963200 }
  0x47   :  { %1353 = dma.done.wait [#allocation12], 2048  }
  0x48   :  { %1354 = vsyncadd [#allocation12], 4294965248  ;;  %v144_v0 = vld [vmem:[#allocation5 + $0x78] sm:$0xff]  ;;  %v143_v1 = vld [vmem:[#allocation5 + $0x70] sm:$0xff]  ;;  %s1365_s13 = smov [#allocation13]  }
  0x49   :  { %946 = vmatprep.subr.mxu0 %v144_v0  ;;  %v142_v2 = vld [vmem:[#allocation5 + $0x68] sm:$0xff]  ;;  %v141_v3 = vld [vmem:[#allocation5 + $0x60] sm:$0xff]  ;;  %v140_v5 = vld [vmem:[#allocation5 + $0x58] sm:$0xff] }
  0x4a   :  { %947 = vmatpush3.msra.mxu0 %v144_v0  ;;  %v1462_v4 = vld [vmem:[#allocation2] sm:$0xff]  ;;  %v139_v6 = vld [vmem:[#allocation5 + $0x50] sm:$0xff]  ;;  %v280_v7 = vld [vmem:[#allocation7 + $0x78] sm:$0xff] }
  0x4b   :  { %948 = vmatprep.subr.mxu0 %v143_v1  ;;  %978 = vmatprep.mubr.f32.mxu0 %v1462_v4  ;;  %v279_v8 = vld [vmem:[#allocation7 + $0x70] sm:$0xff]  ;;  %v138_v9 = vld [vmem:[#allocation5 + $0x48] sm:$0xff]  ;;  %v137_v11 = vld [vmem:[#allocation5 + $0x40] sm:$0xff] }
  0x4c   :  { %949 = vmatpush3.msra.mxu0 %v143_v1  ;;  %990 = vmatprep.subr.mxu1 %v280_v7  ;;  %v278_v10 = vld [vmem:[#allocation7 + $0x68] sm:$0xff]  ;;  %v277_v12 = vld [vmem:[#allocation7 + $0x60] sm:$0xff]  ;;  %v136_v13 = vld [vmem:[#allocation5 + $0x38] sm:$0xff] }
  0x4d   :  { %950 = vmatprep.subr.mxu0 %v142_v2  ;;  %991 = vmatpush3.msra.mxu1 %v280_v7  ;;  %v276_v14 = vld [vmem:[#allocation7 + $0x58] sm:$0xff]  ;;  %v135_v15 = vld [vmem:[#allocation5 + $0x30] sm:$0xff]  ;;  %v134_v17 = vld [vmem:[#allocation5 + $0x28] sm:$0xff] }
  0x4e   :  { %951 = vmatpush3.msra.mxu0 %v142_v2  ;;  %992 = vmatprep.subr.mxu1 %v279_v8  ;;  %v275_v16 = vld [vmem:[#allocation7 + $0x50] sm:$0xff]  ;;  %v274_v18 = vld [vmem:[#allocation7 + $0x48] sm:$0xff]  ;;  %v133_v19 = vld [vmem:[#allocation5 + $0x20] sm:$0xff] }
  0x4f   :  { %952 = vmatprep.subr.mxu0 %v141_v3  ;;  %993 = vmatpush3.msra.mxu1 %v279_v8  ;;  %v273_v20 = vld [vmem:[#allocation7 + $0x40] sm:$0xff]  ;;  %v132_v21 = vld [vmem:[#allocation5 + $0x18] sm:$0xff]  ;;  %v131_v23 = vld [vmem:[#allocation5 + $0x10] sm:$0xff] }
  0x50   :  { %953 = vmatpush3.msra.mxu0 %v141_v3  ;;  %994 = vmatprep.subr.mxu1 %v278_v10  ;;  %v272_v22 = vld [vmem:[#allocation7 + $0x38] sm:$0xff]  ;;  %v271_v24 = vld [vmem:[#allocation7 + $0x30] sm:$0xff]  ;;  %v130_v25 = vld [vmem:[#allocation5 + $0x8] sm:$0xff] }
  0x51   :  { %954 = vmatprep.subr.mxu0 %v140_v5  ;;  %995 = vmatpush3.msra.mxu1 %v278_v10  ;;  %v270_v26 = vld [vmem:[#allocation7 + $0x28] sm:$0xff]  ;;  %v129_v27 = vld [vmem:[#allocation5] sm:$0xff]  ;;  %v1467_v30 = vld [vmem:[#allocation2 + $0x10] sm:$0xff] }
  0x52   :  { %955 = vmatpush3.msra.mxu0 %v140_v5  ;;  %996 = vmatprep.subr.mxu1 %v277_v12  ;;  %v269_v28 = vld [vmem:[#allocation7 + $0x20] sm:$0xff]  ;;  %v1465_v29 = vld [vmem:[#allocation2 + $0x8] sm:$0xff]  ;;  %v1471_v31 = vld [vmem:[#allocation2 + $0x18] sm:$0xff] }
  0x53   :  { %956 = vmatprep.subr.mxu0 %v139_v6  ;;  %997 = vmatpush3.msra.mxu1 %v277_v12  ;;  %v1473_v32 = vld [vmem:[#allocation2 + $0x20] sm:$0xff]  ;;  %v1477_v33 = vld [vmem:[#allocation2 + $0x28] sm:$0xff]  ;;  %v1479_v34 = vld [vmem:[#allocation2 + $0x30] sm:$0xff] }
  0x54   :  { %957 = vmatpush3.msra.mxu0 %v139_v6  ;;  %998 = vmatprep.subr.mxu1 %v276_v14  ;;  %v1483_v35 = vld [vmem:[#allocation2 + $0x38] sm:$0xff]  ;;  %v267_v37 = vld [vmem:[#allocation7 + $0x10] sm:$0xff]  ;;  %v266_v38 = vld [vmem:[#allocation7 + $0x8] sm:$0xff] }
  0x55   :  { %958 = vmatprep.subr.mxu0 %v138_v9  ;;  %999 = vmatpush3.msra.mxu1 %v276_v14  ;;  %v268_v36 = vld [vmem:[#allocation7 + $0x18] sm:$0xff]  ;;  %v265_v39 = vld [vmem:[#allocation7] sm:$0xff]  ;;  %v415_v41 = vld [vmem:[#allocation8 + $0x70] sm:$0xff] }
  0x56   :  { %959 = vmatpush3.msra.mxu0 %v138_v9  ;;  %1000 = vmatprep.subr.mxu1 %v275_v16  ;;  %v416_v40 = vld [vmem:[#allocation8 + $0x78] sm:$0xff]  ;;  %v414_v42 = vld [vmem:[#allocation8 + $0x68] sm:$0xff]  ;;  %v413_v43 = vld [vmem:[#allocation8 + $0x60] sm:$0xff] }
  0x57   :  { %960 = vmatprep.subr.mxu0 %v137_v11  ;;  %1001 = vmatpush3.msra.mxu1 %v275_v16  ;;  %v412_v44 = vld [vmem:[#allocation8 + $0x58] sm:$0xff]  ;;  %v411_v45 = vld [vmem:[#allocation8 + $0x50] sm:$0xff]  ;;  %v410_v46 = vld [vmem:[#allocation8 + $0x48] sm:$0xff] }
  0x58   :  { %961 = vmatpush3.msra.mxu0 %v137_v11  ;;  %1002 = vmatprep.subr.mxu1 %v274_v18  ;;  %v409_v47 = vld [vmem:[#allocation8 + $0x40] sm:$0xff]  ;;  %v408_v48 = vld [vmem:[#allocation8 + $0x38] sm:$0xff]  ;;  %v407_v49 = vld [vmem:[#allocation8 + $0x30] sm:$0xff] }
  0x59   :  { %962 = vmatprep.subr.mxu0 %v136_v13  ;;  %1003 = vmatpush3.msra.mxu1 %v274_v18  ;;  %v406_v50 = vld [vmem:[#allocation8 + $0x28] sm:$0xff]  ;;  %v405_v51 = vld [vmem:[#allocation8 + $0x20] sm:$0xff]  ;;  %v403_v14 = vld [vmem:[#allocation8 + $0x10] sm:$0xff] }
  0x5a   :  { %963 = vmatpush3.msra.mxu0 %v136_v13  ;;  %1004 = vmatprep.subr.mxu1 %v273_v20  ;;  %v821_v52 = vld [vmem:[%s1585_s6] ss:$0 sm:$0xff]  ;;  %v404_v13 = vld [vmem:[#allocation8 + $0x18] sm:$0xff]  ;;  %v543_v18 = vld [vmem:[#allocation10 + $0x70] sm:$0xff] }
  0x5b   :  { %964 = vmatprep.subr.mxu0 %v135_v15  ;;  %1005 = vmatpush3.msra.mxu1 %v273_v20  ;;  %v401_v16 = vld [vmem:[#allocation8] sm:$0xff] }
  0x5c   :  { %965 = vmatpush3.msra.mxu0 %v135_v15  ;;  %1006 = vmatprep.subr.mxu1 %v272_v22  ;;  %v402_v15 = vld [vmem:[#allocation8 + $0x8] sm:$0xff]  ;;  %v541_v20 = vld [vmem:[#allocation10 + $0x60] sm:$0xff] }
  0x5d   :  { %966 = vmatprep.subr.mxu0 %v134_v17  ;;  %1007 = vmatpush3.msra.mxu1 %v272_v22  ;;  %v539_v22 = vld [vmem:[#allocation10 + $0x50] sm:$0xff] }
  0x5e   :  { %967 = vmatpush3.msra.mxu0 %v134_v17  ;;  %1008 = vmatprep.subr.mxu1 %v271_v24  ;;  %v544_v17 = vld [vmem:[#allocation10 + $0x78] sm:$0xff] }
  0x5f   :  { %968 = vmatprep.subr.mxu0 %v133_v19  ;;  %1009 = vmatpush3.msra.mxu1 %v271_v24  ;;  %v537_v24 = vld [vmem:[#allocation10 + $0x40] sm:$0xff] }
  0x60   :  { %969 = vmatpush3.msra.mxu0 %v133_v19  ;;  %1010 = vmatprep.subr.mxu1 %v270_v26  ;;  %v542_v19 = vld [vmem:[#allocation10 + $0x68] sm:$0xff] }
  0x61   :  { %970 = vmatprep.subr.mxu0 %v132_v21  ;;  %1011 = vmatpush3.msra.mxu1 %v270_v26  ;;  %v535_v26 = vld [vmem:[#allocation10 + $0x30] sm:$0xff] }
  0x62   :  { %971 = vmatpush3.msra.mxu0 %v132_v21  ;;  %1012 = vmatprep.subr.mxu1 %v269_v28  ;;  %v540_v21 = vld [vmem:[#allocation10 + $0x58] sm:$0xff] }
  0x63   :  { %972 = vmatprep.subr.mxu0 %v131_v23  ;;  %1013 = vmatpush3.msra.mxu1 %v269_v28  ;;  %v533_v28 = vld [vmem:[#allocation10 + $0x20] sm:$0xff] }
  0x64   :  { %973 = vmatpush3.msra.mxu0 %v131_v23  ;;  %1014 = vmatprep.subr.mxu1 %v268_v36  ;;  %v538_v23 = vld [vmem:[#allocation10 + $0x48] sm:$0xff] }
  0x65   :  { %974 = vmatprep.subr.mxu0 %v130_v25  ;;  %1015 = vmatpush3.msra.mxu1 %v268_v36 }
  0x66   :  { %975 = vmatpush3.msra.mxu0 %v130_v25  ;;  %1016 = vmatprep.subr.mxu1 %v267_v37  ;;  %v536_v25 = vld [vmem:[#allocation10 + $0x38] sm:$0xff] }
  0x67   :  { %976 = vmatprep.subr.mxu0 %v129_v27  ;;  %1017 = vmatpush3.msra.mxu1 %v267_v37 }
  0x68   :  { %977 = vmatpush3.msra.mxu0 %v129_v27  ;;  %1018 = vmatprep.subr.mxu1 %v266_v38  ;;  %v534_v27 = vld [vmem:[#allocation10 + $0x28] sm:$0xff] }
  0x69   :  { %979 = vmatmul.mubr.f32.vlgmr.msra.gmra.mxu0 %v1465_v29  ;;  %1019 = vmatpush3.msra.mxu1 %v266_v38 }
  0x6a   :  { %981 = vmatprep.mubr.f32.mxu0 %v1467_v30  ;;  %1020 = vmatprep.subr.mxu1 %v265_v39 }
  0x6b   :  { %1021 = vmatpush3.msra.mxu1 %v265_v39  ;;  %1034 = vmatprep.subr.mxu0 %v416_v40 }
  0x6c   :  { %1035 = vmatpush3.msra.mxu0 %v416_v40  ;;  %1078 = vmatprep.subr.mxu1 %v544_v17 }
  0x6d   :  { %982 = vmatmul.mubr.f32.gmra.mxu0 %v1471_v31  ;;  %1036 = vmatprep.subr.mxu0 %v415_v41 }
  0x6e   :  { %984 = vmatprep.mubr.f32.mxu0 %v1473_v32  ;;  %1037 = vmatpush3.msra.mxu0 %v415_v41 }
  0x6f   :  { %1038 = vmatprep.subr.mxu0 %v414_v42 }
  0x70   :  { %1039 = vmatpush3.msra.mxu0 %v414_v42 }
  0x71   :  { %985 = vmatmul.mubr.f32.gmra.mxu0 %v1477_v33  ;;  %1040 = vmatprep.subr.mxu0 %v413_v43 }
  0x72   :  { %987 = vmatprep.mubr.f32.mxu0 %v1479_v34  ;;  %1041 = vmatpush3.msra.mxu0 %v413_v43 }
  0x73   :  { %1042 = vmatprep.subr.mxu0 %v412_v44 }
  0x74   :  { %1043 = vmatpush3.msra.mxu0 %v412_v44 }
  0x75   :  { %988 = vmatmul.mubr.f32.gmra.mxu0 %v1483_v35  ;;  %1044 = vmatprep.subr.mxu0 %v411_v45 }
  0x76   :  { %1045 = vmatpush3.msra.mxu0 %v411_v45 }
  0x77   :  { %1046 = vmatprep.subr.mxu0 %v410_v46 }
  0x78   :  { %1047 = vmatpush3.msra.mxu0 %v410_v46 }
  0x79   :  { %1048 = vmatprep.subr.mxu0 %v409_v47 }
  0x7a   :  { %1049 = vmatpush3.msra.mxu0 %v409_v47 }
  0x7b   :  { %1050 = vmatprep.subr.mxu0 %v408_v48 }
  0x7c   :  { %1051 = vmatpush3.msra.mxu0 %v408_v48 }
  0x7d   :  { %1052 = vmatprep.subr.mxu0 %v407_v49 }
  0x7e   :  { %1053 = vmatpush3.msra.mxu0 %v407_v49 }
  0x7f   :  { %1054 = vmatprep.subr.mxu0 %v406_v50 }
  0x80   :  { %1055 = vmatpush3.msra.mxu0 %v406_v50 }
  0x81   :  { %1056 = vmatprep.subr.mxu0 %v405_v51 }
  0x82   :  { %1057 = vmatpush3.msra.mxu0 %v405_v51 }
  0x83   :  { %1058 = vmatprep.subr.mxu0 %v404_v13 }
  0x84   :  { %1059 = vmatpush3.msra.mxu0 %v404_v13 }
  0x85   :  { %1060 = vmatprep.subr.mxu0 %v403_v14 }
  0x86   :  { %1061 = vmatpush3.msra.mxu0 %v403_v14 }
  0x87   :  { %1062 = vmatprep.subr.mxu0 %v402_v15 }
  0x88   :  { %1063 = vmatpush3.msra.mxu0 %v402_v15 }
  0x89   :  { %1064 = vmatprep.subr.mxu0 %v401_v16 }
  0x8a   :  { %1065 = vmatpush3.msra.mxu0 %v401_v16 }
 0x129   :  { %v980_v53 = vpop.f32.mrf.mxu0 }
 0x12a   :  { %v224_v54 = vadd.f32 %v980_v53, %v821_v52 }
 0x12b   :  { %v218_v55 = vpop.f32.mrf.mxu0 }
 0x12c   :  { %v219_v56 = vadd.f32 %v821_v52, %v218_v55  ;;  %v1493_v59 = vadd.f32 %v224_v54, %v1465_v29  ;;  %v532_v29 = vld [vmem:[#allocation10 + $0x18] sm:$0xff]  ;;  %v531_v55 = vld [vmem:[#allocation10 + $0x10] sm:$0xff] }
 0x12d   :  { %v983_v57 = vpop.f32.mrf.mxu0 }
 0x12e   :  { %v1490_v58 = vadd.f32 %v219_v56, %v1462_v4  ;;  %v234_v60 = vadd.f32 %v983_v57, %v821_v52  ;;  %v530_v56 = vld [vmem:[#allocation10 + $0x8] sm:$0xff]  ;;  %v529_v57 = vld [vmem:[#allocation10] sm:$0xff] }
 0x12f   :  { %v228_v61 = vpop.f32.mrf.mxu0 }
 0x130   :  { %v229_v62 = vadd.f32 %v821_v52, %v228_v61  ;;  %1022 = vmatprep.mubr.f32.mxu1 %v1490_v58  ;;  %v1501_v1 = vadd.f32 %v234_v60, %v1471_v31  ;;  %v678_v60 = vld [vmem:[#allocation11 + $0x68] sm:$0xff]  ;;  %v677_v61 = vld [vmem:[#allocation11 + $0x60] sm:$0xff] }
 0x131   :  { %v986_v63 = vpop.f32.mrf.mxu0  ;;  %1023 = vmatmul.mubr.f32.vlgmr.msra.gmra.mxu1 %v1493_v59 }
 0x132   :  { %v1498_v0 = vadd.f32 %v229_v62, %v1467_v30  ;;  %v244_v2 = vadd.f32 %v986_v63, %v821_v52  ;;  %1079 = vmatpush3.msra.mxu1 %v544_v17  ;;  %v822_v30 = vld [vmem:[%s1586_s7] ss:$0 sm:$0xff]  ;;  %v676_v62 = vld [vmem:[#allocation11 + $0x58] sm:$0xff]  ;;  %v675_v63 = vld [vmem:[#allocation11 + $0x50] sm:$0xff] }
 0x133   :  { %v238_v3 = vpop.f32.mrf.mxu0  ;;  %1080 = vmatprep.subr.mxu1 %v543_v18 }
 0x134   :  { %v239_v4 = vadd.f32 %v821_v52, %v238_v3  ;;  %1025 = vmatprep.mubr.f32.mxu1 %v1498_v0  ;;  %v1509_v7 = vadd.f32 %v244_v2, %v1477_v33  ;;  %1081 = vmatpush3.msra.mxu1 %v543_v18  ;;  %v672_v2 = vld [vmem:[#allocation11 + $0x38] sm:$0xff]  ;;  %v671_v3 = vld [vmem:[#allocation11 + $0x30] sm:$0xff] }
 0x135   :  { %v989_v5 = vpop.f32.mrf.mxu0  ;;  %1026 = vmatmul.mubr.f32.gmra.mxu1 %v1501_v1  ;;  %1082 = vmatprep.subr.mxu1 %v542_v19 }
 0x136   :  { %v1506_v6 = vadd.f32 %v239_v4, %v1473_v32  ;;  %v254_v8 = vadd.f32 %v989_v5, %v821_v52  ;;  %1083 = vmatpush3.msra.mxu1 %v542_v19  ;;  %v670_v4 = vld [vmem:[#allocation11 + $0x28] sm:$0xff]  ;;  %v669_v5 = vld [vmem:[#allocation11 + $0x20] sm:$0xff] }
 0x137   :  { %v248_v9 = vpop.f32.mrf.mxu0  ;;  %1084 = vmatprep.subr.mxu1 %v541_v20 }
 0x138   :  { %v249_v10 = vadd.f32 %v821_v52, %v248_v9  ;;  %1028 = vmatprep.mubr.f32.mxu1 %v1506_v6  ;;  %v1517_v12 = vadd.f32 %v254_v8, %v1483_v35  ;;  %1085 = vmatpush3.msra.mxu1 %v541_v20 }
 0x139   :  { %1029 = vmatmul.mubr.f32.gmra.mxu1 %v1509_v7  ;;  %1086 = vmatprep.subr.mxu1 %v540_v21 }
 0x13a   :  { %v1514_v11 = vadd.f32 %v249_v10, %v1479_v34  ;;  %1087 = vmatpush3.msra.mxu1 %v540_v21 }
 0x13b   :  { %1088 = vmatprep.subr.mxu1 %v539_v22 }
 0x13c   :  { %1031 = vmatprep.mubr.f32.mxu1 %v1514_v11  ;;  %1089 = vmatpush3.msra.mxu1 %v539_v22 }
 0x13d   :  { %1032 = vmatmul.mubr.f32.gmra.mxu1 %v1517_v12  ;;  %1090 = vmatprep.subr.mxu1 %v538_v23 }
 0x13e   :  { %1091 = vmatpush3.msra.mxu1 %v538_v23  ;;  %v668_v23 = vld [vmem:[#allocation11 + $0x18] sm:$0xff] }
 0x13f   :  { %1092 = vmatprep.subr.mxu1 %v537_v24 }
 0x140   :  { %1093 = vmatpush3.msra.mxu1 %v537_v24  ;;  %v667_v24 = vld [vmem:[#allocation11 + $0x10] sm:$0xff] }
 0x141   :  { %1094 = vmatprep.subr.mxu1 %v536_v25 }
 0x142   :  { %1095 = vmatpush3.msra.mxu1 %v536_v25  ;;  %v666_v25 = vld [vmem:[#allocation11 + $0x8] sm:$0xff] }
 0x143   :  { %1096 = vmatprep.subr.mxu1 %v535_v26 }
 0x144   :  { %1097 = vmatpush3.msra.mxu1 %v535_v26  ;;  %v665_v26 = vld [vmem:[#allocation11] sm:$0xff] }
 0x145   :  { %1098 = vmatprep.subr.mxu1 %v534_v27 }
 0x146   :  { %1099 = vmatpush3.msra.mxu1 %v534_v27  ;;  %v824_v27 = vld [vmem:[%s1588_s9] ss:$0 sm:$0xff] }
 0x147   :  { %1100 = vmatprep.subr.mxu1 %v533_v28 }
 0x148   :  { %1101 = vmatpush3.msra.mxu1 %v533_v28 }
 0x149   :  { %1102 = vmatprep.subr.mxu1 %v532_v29 }
 0x14a   :  { %1103 = vmatpush3.msra.mxu1 %v532_v29 }
 0x14b   :  { %1104 = vmatprep.subr.mxu1 %v531_v55 }
 0x14c   :  { %1105 = vmatpush3.msra.mxu1 %v531_v55 }
 0x14d   :  { %1106 = vmatprep.subr.mxu1 %v530_v56 }
 0x14e   :  { %1107 = vmatpush3.msra.mxu1 %v530_v56 }
 0x14f   :  { %1108 = vmatprep.subr.mxu1 %v529_v57 }
 0x150   :  { %1109 = vmatpush3.msra.mxu1 %v529_v57 }
 0x1f1   :  { %v1024_v31 = vpop.f32.mrf.mxu1 }
 0x1f2   :  { %v360_v32 = vadd.f32 %v1024_v31, %v822_v30 }
 0x1f3   :  { %v354_v33 = vpop.f32.mrf.mxu1 }
 0x1f4   :  { %v355_v34 = vadd.f32 %v822_v30, %v354_v33  ;;  %v394_v37 = vadd.f32 %v360_v32, %v1493_v59  ;;  %v679_v59 = vld [vmem:[#allocation11 + $0x70] sm:$0xff] }
 0x1f5   :  { %v1027_v35 = vpop.f32.mrf.mxu1 }
 0x1f6   :  { %v393_v36 = vadd.f32 %v355_v34, %v1490_v58  ;;  %v370_v38 = vadd.f32 %v1027_v35, %v822_v30  ;;  %v680_v58 = vld [vmem:[#allocation11 + $0x78] sm:$0xff] }
 0x1f7   :  { %v364_v39 = vpop.f32.mrf.mxu1  ;;  %1122 = vmatprep.subr.mxu0 %v680_v58  ;;  %1166 = vmatprep.subr.mxu1 %v680_v58 }
 0x1f8   :  { %v365_v40 = vadd.f32 %v822_v30, %v364_v39  ;;  %1066 = vmatprep.mubr.f32.mxu0 %v393_v36  ;;  %v396_v43 = vadd.f32 %v370_v38, %v1501_v1  ;;  %v673_v1 = vld [vmem:[#allocation11 + $0x40] sm:$0xff] }
 0x1f9   :  { %v1030_v41 = vpop.f32.mrf.mxu1  ;;  %1067 = vmatmul.mubr.f32.vlgmr.msra.gmra.mxu0 %v394_v37 }
 0x1fa   :  { %v395_v42 = vadd.f32 %v365_v40, %v1498_v0  ;;  %v380_v44 = vadd.f32 %v1030_v41, %v822_v30  ;;  %1123 = vmatpush3.msra.mxu0 %v680_v58  ;;  %v674_v0 = vld [vmem:[#allocation11 + $0x48] sm:$0xff] }
 0x1fb   :  { %v374_v45 = vpop.f32.mrf.mxu1  ;;  %1124 = vmatprep.subr.mxu0 %v679_v59 }
 0x1fc   :  { %v375_v46 = vadd.f32 %v822_v30, %v374_v45  ;;  %1069 = vmatprep.mubr.f32.mxu0 %v395_v42  ;;  %v398_v49 = vadd.f32 %v380_v44, %v1509_v7  ;;  %1125 = vmatpush3.msra.mxu0 %v679_v59  ;;  %v823_v7 = vld [vmem:[%s1587_s8] ss:$0 sm:$0xff] }
 0x1fd   :  { %v1033_v47 = vpop.f32.mrf.mxu1  ;;  %1070 = vmatmul.mubr.f32.gmra.mxu0 %v396_v43  ;;  %1126 = vmatprep.subr.mxu0 %v678_v60 }
 0x1fe   :  { %v397_v48 = vadd.f32 %v375_v46, %v1506_v6  ;;  %v390_v50 = vadd.f32 %v1033_v47, %v822_v30  ;;  %1127 = vmatpush3.msra.mxu0 %v678_v60 }
 0x1ff   :  { %v384_v51 = vpop.f32.mrf.mxu1  ;;  %1128 = vmatprep.subr.mxu0 %v677_v61 }
 0x200   :  { %v385_v52 = vadd.f32 %v822_v30, %v384_v51  ;;  %1072 = vmatprep.mubr.f32.mxu0 %v397_v48  ;;  %v400_v54 = vadd.f32 %v390_v50, %v1517_v12  ;;  %1129 = vmatpush3.msra.mxu0 %v677_v61 }
 0x201   :  { %1073 = vmatmul.mubr.f32.gmra.mxu0 %v398_v49  ;;  %1130 = vmatprep.subr.mxu0 %v676_v62 }
 0x202   :  { %v399_v53 = vadd.f32 %v385_v52, %v1514_v11  ;;  %1131 = vmatpush3.msra.mxu0 %v676_v62  ;;  %v825_v52 = vld [vmem:[%s1589_s10] ss:$0 sm:$0xff]  ;;  %s806_s10 = sshll.u32 %s1365_s13, 4  ;;  %s807_s10 = int_to_ptr.vmem [resolvable:$true] %s806_s10 }
 0x203   :  { %1132 = vmatprep.subr.mxu0 %v675_v63  ;;  %s1327_s1 = scalar_lea.vmem %s807_s10, 1024  ;;  %p1332_p3 = scmp.lt.s32.totalorder %s807_s10, %s807_s10 }
 0x204   :  { %1075 = vmatprep.mubr.f32.mxu0 %v399_v53  ;;  %1133 = vmatpush3.msra.mxu0 %v675_v63  ;;  %p1328_p2 = scmp.ne.s32.totalorder %s807_s10, %s1327_s1  ;;  %p1333_p4 = scmp.lt.s32.totalorder %s1327_s1, %s1327_s1 }
 0x205   :  { %1076 = vmatmul.mubr.f32.gmra.mxu0 %v400_v54  ;;  %1134 = vmatprep.subr.mxu0 %v674_v0 }
 0x206   :  { %1135 = vmatpush3.msra.mxu0 %v674_v0  ;;  %p1334_p5 = por %p1333_p4, %p1332_p3 }
 0x207   :  { %1136 = vmatprep.subr.mxu0 %v673_v1 }
 0x208   :  { %1137 = vmatpush3.msra.mxu0 %v673_v1  ;;  %p1335_p6 = pnand %p1334_p5, %p1328_p2 }
 0x209   :  { %1138 = vmatprep.subr.mxu0 %v672_v2 }
 0x20a   :  { %1139 = vmatpush3.msra.mxu0 %v672_v2 }
 0x20b   :  { %1140 = vmatprep.subr.mxu0 %v671_v3 }
 0x20c   :  { %1141 = vmatpush3.msra.mxu0 %v671_v3 }
 0x20d   :  { %1142 = vmatprep.subr.mxu0 %v670_v4 }
 0x20e   :  { %1143 = vmatpush3.msra.mxu0 %v670_v4 }
 0x20f   :  { %1144 = vmatprep.subr.mxu0 %v669_v5 }
 0x210   :  { %1145 = vmatpush3.msra.mxu0 %v669_v5 }
 0x211   :  { %1146 = vmatprep.subr.mxu0 %v668_v23 }
 0x212   :  { %1147 = vmatpush3.msra.mxu0 %v668_v23 }
 0x213   :  { %1148 = vmatprep.subr.mxu0 %v667_v24 }
 0x214   :  { %1149 = vmatpush3.msra.mxu0 %v667_v24 }
 0x215   :  { %1150 = vmatprep.subr.mxu0 %v666_v25 }
 0x216   :  { %1151 = vmatpush3.msra.mxu0 %v666_v25 }
 0x217   :  { %1152 = vmatprep.subr.mxu0 %v665_v26 }
 0x218   :  { %1153 = vmatpush3.msra.mxu0 %v665_v26 }
 0x2b9   :  { %v1068_v6 = vpop.f32.mrf.mxu0 }
 0x2ba   :  { %v1537_v10 = vadd.f32 %v1068_v6, %v823_v7 }
 0x2bb   :  { %v490_v8 = vpop.f32.mrf.mxu0 }
 0x2bc   :  { %v1535_v9 = vadd.f32 %v823_v7, %v490_v8 }
 0x2bd   :  { %v1071_v11 = vpop.f32.mrf.mxu0 }
 0x2be   :  { %1110 = vmatprep.mubr.f32.mxu1 %v1535_v9  ;;  %v1543_v14 = vadd.f32 %v1071_v11, %v823_v7 }
 0x2bf   :  { %v500_v12 = vpop.f32.mrf.mxu0  ;;  %1111 = vmatmul.mubr.f32.vlgmr.msra.gmra.mxu1 %v1537_v10 }
 0x2c0   :  { %v1541_v13 = vadd.f32 %v823_v7, %v500_v12  ;;  %1182 = vmatpush3.msra.mxu1 %v680_v58 }
 0x2c1   :  { %v1074_v15 = vpop.f32.mrf.mxu0  ;;  %1167 = vmatprep.subr.mxu1 %v679_v59 }
 0x2c2   :  { %1113 = vmatprep.mubr.f32.mxu1 %v1541_v13  ;;  %1183 = vmatpush3.msra.mxu1 %v679_v59  ;;  %v1549_v18 = vadd.f32 %v1074_v15, %v823_v7 }
 0x2c3   :  { %v510_v16 = vpop.f32.mrf.mxu0  ;;  %1114 = vmatmul.mubr.f32.gmra.mxu1 %v1543_v14  ;;  %1168 = vmatprep.subr.mxu1 %v678_v60 }
 0x2c4   :  { %v1547_v17 = vadd.f32 %v823_v7, %v510_v16  ;;  %1184 = vmatpush3.msra.mxu1 %v678_v60 }
 0x2c5   :  { %v1077_v19 = vpop.f32.mrf.mxu0  ;;  %1169 = vmatprep.subr.mxu1 %v677_v61 }
 0x2c6   :  { %1116 = vmatprep.mubr.f32.mxu1 %v1547_v17  ;;  %1185 = vmatpush3.msra.mxu1 %v677_v61  ;;  %v1555_v22 = vadd.f32 %v1077_v19, %v823_v7 }
 0x2c7   :  { %v520_v20 = vpop.f32.mrf.mxu0  ;;  %1117 = vmatmul.mubr.f32.gmra.mxu1 %v1549_v18  ;;  %1170 = vmatprep.subr.mxu1 %v676_v62 }
 0x2c8   :  { %v1553_v21 = vadd.f32 %v823_v7, %v520_v20  ;;  %1186 = vmatpush3.msra.mxu1 %v676_v62 }
 0x2c9   :  { %1171 = vmatprep.subr.mxu1 %v675_v63 }
 0x2ca   :  { %1119 = vmatprep.mubr.f32.mxu1 %v1553_v21  ;;  %1187 = vmatpush3.msra.mxu1 %v675_v63 }
 0x2cb   :  { %1120 = vmatmul.mubr.f32.gmra.mxu1 %v1555_v22  ;;  %1172 = vmatprep.subr.mxu1 %v674_v0 }
 0x2cc   :  { %1188 = vmatpush3.msra.mxu1 %v674_v0 }
 0x2cd   :  { %1173 = vmatprep.subr.mxu1 %v673_v1 }
 0x2ce   :  { %1189 = vmatpush3.msra.mxu1 %v673_v1 }
 0x2cf   :  { %1174 = vmatprep.subr.mxu1 %v672_v2 }
 0x2d0   :  { %1190 = vmatpush3.msra.mxu1 %v672_v2 }
 0x2d1   :  { %1175 = vmatprep.subr.mxu1 %v671_v3 }
 0x2d2   :  { %1191 = vmatpush3.msra.mxu1 %v671_v3 }
 0x2d3   :  { %1176 = vmatprep.subr.mxu1 %v670_v4 }
 0x2d4   :  { %1192 = vmatpush3.msra.mxu1 %v670_v4 }
 0x2d5   :  { %1177 = vmatprep.subr.mxu1 %v669_v5 }
 0x2d6   :  { %1193 = vmatpush3.msra.mxu1 %v669_v5 }
 0x2d7   :  { %1178 = vmatprep.subr.mxu1 %v668_v23 }
 0x2d8   :  { %1194 = vmatpush3.msra.mxu1 %v668_v23 }
 0x2d9   :  { %1179 = vmatprep.subr.mxu1 %v667_v24 }
 0x2da   :  { %1195 = vmatpush3.msra.mxu1 %v667_v24 }
 0x2db   :  { %1180 = vmatprep.subr.mxu1 %v666_v25 }
 0x2dc   :  { %1196 = vmatpush3.msra.mxu1 %v666_v25 }
 0x2dd   :  { %1181 = vmatprep.subr.mxu1 %v665_v26 }
 0x2de   :  { %1197 = vmatpush3.msra.mxu1 %v665_v26 }
 0x37f   :  { %v1112_v28 = vpop.f32.mrf.mxu1 }
 0x380   :  { %v624_v29 = vadd.f32 %v1112_v28, %v824_v27 }
 0x381   :  { %v618_v30 = vpop.f32.mrf.mxu1 }
 0x382   :  { %v619_v31 = vadd.f32 %v824_v27, %v618_v30  ;;  %v658_v34 = vadd.f32 %v624_v29, %v1537_v10 }
 0x383   :  { %v1115_v32 = vpop.f32.mrf.mxu1 }
 0x384   :  { %v657_v33 = vadd.f32 %v619_v31, %v1535_v9  ;;  %v634_v35 = vadd.f32 %v1115_v32, %v824_v27 }
 0x385   :  { %v628_v36 = vpop.f32.mrf.mxu1 }
 0x386   :  { %v629_v37 = vadd.f32 %v824_v27, %v628_v36  ;;  %1154 = vmatprep.mubr.f32.mxu0 %v657_v33  ;;  %v660_v40 = vadd.f32 %v634_v35, %v1543_v14 }
 0x387   :  { %v1118_v38 = vpop.f32.mrf.mxu1  ;;  %1155 = vmatmul.mubr.f32.vlgmr.msra.gmra.mxu0 %v658_v34 }
 0x388   :  { %v659_v39 = vadd.f32 %v629_v37, %v1541_v13  ;;  %v644_v41 = vadd.f32 %v1118_v38, %v824_v27 }
 0x389   :  { %v638_v42 = vpop.f32.mrf.mxu1 }
 0x38a   :  { %v639_v43 = vadd.f32 %v824_v27, %v638_v42  ;;  %1157 = vmatprep.mubr.f32.mxu0 %v659_v39  ;;  %v662_v46 = vadd.f32 %v644_v41, %v1549_v18 }
 0x38b   :  { %v1121_v44 = vpop.f32.mrf.mxu1  ;;  %1158 = vmatmul.mubr.f32.gmra.mxu0 %v660_v40 }
 0x38c   :  { %v661_v45 = vadd.f32 %v639_v43, %v1547_v17  ;;  %v654_v47 = vadd.f32 %v1121_v44, %v824_v27 }
 0x38d   :  { %v648_v48 = vpop.f32.mrf.mxu1 }
 0x38e   :  { %v649_v49 = vadd.f32 %v824_v27, %v648_v48  ;;  %1160 = vmatprep.mubr.f32.mxu1 %v661_v45  ;;  %v664_v51 = vadd.f32 %v654_v47, %v1555_v22 }
 0x38f   :  { %1161 = vmatmul.mubr.f32.vlgmr.msra.gmra.mxu1 %v662_v46 }
 0x390   :  { %v663_v50 = vadd.f32 %v649_v49, %v1553_v21 }
 0x392   :  { %1163 = vmatprep.mubr.f32.mxu1 %v663_v50 }
 0x393   :  { %1164 = vmatmul.mubr.f32.gmra.mxu1 %v664_v51 }
 0x447   :  { %v1156_v53 = vpop.f32.mrf.mxu0 }
 0x448   :  { %v760_v54 = vadd.f32 %v1156_v53, %v825_v52 }
 0x449   :  { %v754_v55 = vpop.f32.mrf.mxu0 }
 0x44a   :  { %794 = vst [vmem:[#allocation13 + $0x8] sm:$0xff] %v760_v54  ;;  %v755_v56 = vadd.f32 %v825_v52, %v754_v55 }
 0x44b   :  { %v1159_v57 = vpop.f32.mrf.mxu0 }
 0x44c   :  { %793 = vst [vmem:[#allocation13] sm:$0xff] %v755_v56  ;;  %v770_v58 = vadd.f32 %v1159_v57, %v825_v52 }
 0x44d   :  { %v764_v59 = vpop.f32.mrf.mxu0 }
 0x44e   :  { %796 = vst [vmem:[#allocation13 + $0x18] sm:$0xff] %v770_v58  ;;  %v765_v60 = vadd.f32 %v825_v52, %v764_v59 }
 0x44f   :  { %v1162_v61 = vpop.f32.mrf.mxu1 }
 0x450   :  { %795 = vst [vmem:[#allocation13 + $0x10] sm:$0xff] %v765_v60  ;;  %v780_v62 = vadd.f32 %v1162_v61, %v825_v52 }
 0x451   :  { %v774_v63 = vpop.f32.mrf.mxu1 }
 0x452   :  { %798 = vst [vmem:[#allocation13 + $0x28] sm:$0xff] %v780_v62  ;;  %v775_v0 = vadd.f32 %v825_v52, %v774_v63 }
 0x453   :  { %v1165_v1 = vpop.f32.mrf.mxu1 }
 0x454   :  { %797 = vst [vmem:[#allocation13 + $0x20] sm:$0xff] %v775_v0  ;;  %v790_v2 = vadd.f32 %v1165_v1, %v825_v52 }
 0x455   :  { %v784_v3 = vpop.f32.mrf.mxu1 }
 0x456   :  { %800 = vst [vmem:[#allocation13 + $0x38] sm:$0xff] %v790_v2  ;;  %v785_v4 = vadd.f32 %v825_v52, %v784_v3 }
 0x458   :  { %799 = vst [vmem:[#allocation13 + $0x30] sm:$0xff] %v785_v4 }
 0x459   :  { %1338 = shalt.err (!%p1335_p6)
}
 0x45a   :  { %812 = dma.vmem_to_hbm [thread:$0]  %s807_s10, 1024, %s1590_s11, [#allocation4], %s1359_s22, %s1359_s22, %s1360_s23  }
 0x45b   :  { %1355 = dma.done.wait [#allocation4], 1024  }
 0x45c   :  { %1356 = vsyncadd [#allocation4], 4294966272 }
 0x45d   :  { %816 = vsyncpa [#allocation3], 1 }
 0x45e   :  { %817 = vsyncpa [#allocation6], 1 }
 0x45f   :  { %818 = vsyncpa [#allocation9], 1 }
 0x460   :  { %819 = vsyncpa [#allocation12], 1 }
 0x461   :  { %820 = vsyncpa [#allocation4], 1 }

// kernel: tpu_custom_call.1
= control target key start
LH: loop header
LB: loop body
LE: loop exit
PB: predicated region body
PF: predicated region fallthrough
CT: control target
= control target key end

     0   :  { %16 = vsyncpa [#allocation3], 0  ;;  %s1579_s0 = inlined_call_operand.hbm [shape: f32[64,128], index: 0, kind: input, shape index: {}]   ;;  %s1580_s1 = inlined_call_operand.hbm [shape: f32[128,128], index: 1, kind: input, shape index: {}]   ;;  %s1581_s2 = inlined_call_operand.hbm [shape: f32[128,128], index: 2, kind: input, shape index: {}]   ;;  %s1582_s3 = inlined_call_operand.hbm [shape: f32[128,128], index: 3, kind: input, shape index: {}]   ;;  %s1583_s4 = inlined_call_operand.hbm [shape: f32[128,128], index: 4, kind: input, shape index: {}]   ;;  %s1584_s5 = inlined_call_operand.hbm [shape: f32[128,128], index: 5, kind: input, shape index: {}]   ;;  %s1585_s6 = inlined_call_operand.vmem [shape: f32[1,128], index: 6, kind: input, shape index: {}]   ;;  %s1586_s7 = inlined_call_operand.vmem [shape: f32[1,128], index: 7, kind: input, shape index: {}]   ;;  %s1587_s8 = inlined_call_operand.vmem [shape: f32[1,128], index: 8, kind: input, shape index: {}]   ;;  %s1588_s9 = inlined_call_operand.vmem [shape: f32[1,128], index: 9, kind: input, shape index: {}]   ;;  %s1589_s10 = inlined_call_operand.vmem [shape: f32[1,128], index: 10, kind: input, shape index: {}]   ;;  %s1590_s11 = inlined_call_operand.hbm [shape: f32[64,128], index: 11, kind: output, shape index: {}]  }
   0x1   :  { %17 = vsyncpa [#allocation6], 0 }
   0x2   :  { %18 = vsyncpa [#allocation9], 0 }
   0x3   :  { %19 = vsyncpa [#allocation12], 0 }
   0x4   :  { %20 = vsyncpa [#allocation4], 0  ;;  %s1357_s17 = smov [#allocation5]   ;;  %s1358_s19 = smov [#allocation8]  }
   0x5   :  { %s38_s18 = sshll.u32 %s1357_s17, 4  ;;  %s62_s20 = sshll.u32 %s1358_s19, 4  ;;  %s39_s18 = int_to_ptr.vmem [resolvable:$true] %s38_s18  ;;  %s63_s20 = int_to_ptr.vmem [resolvable:$true] %s62_s20 }
   0x6   :  { %s1215_s21 = scalar_lea.vmem %s39_s18, 2048  ;;  %p1220_p1 = scmp.lt.s32.totalorder %s39_s18, %s39_s18 }
   0x7   :  { %p1216_p0 = scmp.ne.s32.totalorder %s39_s18, %s1215_s21  ;;  %p1221_p2 = scmp.lt.s32.totalorder %s1215_s21, %s1215_s21 }
   0x9   :  { %p1222_p3 = por %p1221_p2, %p1220_p1 }
   0xb   :  { %p1223_p4 = pnand %p1222_p3, %p1216_p0 }
   0xd   :  { %1226 = shalt.err (!%p1223_p4)
}
   0xe   :  { %s1359_s22 = smov 128   ;;  %s1360_s23 = smov 8  }
   0xf   :  { %44 = dma.hbm_to_vmem [thread:$0]  %s1580_s1, 2048, %s39_s18, [#allocation6], %s1359_s22, %s1359_s22, %s1360_s23  }
  0x10   :  { %s1235_s26 = scalar_lea.vmem %s63_s20, 2048  ;;  %p1240_p6 = scmp.lt.s32.totalorder %s63_s20, %s63_s20 }
  0x11   :  { %p1236_p5 = scmp.ne.s32.totalorder %s63_s20, %s1235_s26  ;;  %p1241_p7 = scmp.lt.s32.totalorder %s1235_s26, %s1235_s26 }
  0x13   :  { %p1242_p8 = por %p1241_p7, %p1240_p6 }
  0x15   :  { %p1243_p9 = pnand %p1242_p8, %p1236_p5 }
  0x17   :  { %1246 = shalt.err (!%p1243_p9)
}
  0x18   :  { %68 = dma.hbm_to_vmem [thread:$0]  %s1582_s3, 2048, %s63_s20, [#allocation9], %s1359_s22, %s1359_s22, %s1360_s23  }
  0x19   :  { %s1361_s29 = smov [#allocation2]   ;;  %s1362_s12 = smov [#allocation7]  }
  0x1a   :  { %s26_s30 = sshll.u32 %s1361_s29, 4  ;;  %s50_s13 = sshll.u32 %s1362_s12, 4  ;;  %s27_s30 = int_to_ptr.vmem [resolvable:$true] %s26_s30  ;;  %s51_s13 = int_to_ptr.vmem [resolvable:$true] %s50_s13 }
  0x1b   :  { %s1255_s1 = scalar_lea.vmem %s27_s30, 1024  ;;  %p1260_p11 = scmp.lt.s32.totalorder %s27_s30, %s27_s30 }
  0x1c   :  { %p1256_p10 = scmp.ne.s32.totalorder %s27_s30, %s1255_s1  ;;  %p1261_p12 = scmp.lt.s32.totalorder %s1255_s1, %s1255_s1 }
  0x1e   :  { %p1262_p13 = por %p1261_p12, %p1260_p11 }
  0x20   :  { %p1263_p0 = pnand %p1262_p13, %p1256_p10 }
  0x22   :  { %1266 = shalt.err (!%p1263_p0)
}
  0x23   :  { %32 = dma.hbm_to_vmem [thread:$0]  %s1579_s0, 1024, %s27_s30, [#allocation3], %s1359_s22, %s1359_s22, %s1360_s23  }
  0x24   :  { %s1275_s3 = scalar_lea.vmem %s51_s13, 2048  ;;  %p1280_p2 = scmp.lt.s32.totalorder %s51_s13, %s51_s13 }
  0x25   :  { %p1276_p1 = scmp.ne.s32.totalorder %s51_s13, %s1275_s3  ;;  %p1281_p3 = scmp.lt.s32.totalorder %s1275_s3, %s1275_s3 }
  0x27   :  { %p1282_p4 = por %p1281_p3, %p1280_p2 }
  0x29   :  { %p1283_p5 = pnand %p1282_p4, %p1276_p1 }
  0x2b   :  { %1286 = shalt.err (!%p1283_p5)
}
  0x2c   :  { %56 = dma.hbm_to_vmem [thread:$0]  %s1581_s2, 2048, %s51_s13, [#allocation6], %s1359_s22, %s1359_s22, %s1360_s23  }
  0x2d   :  { %s1363_s18 = smov [#allocation10]   ;;  %s1364_s20 = smov [#allocation11]  }
  0x2e   :  { %s74_s19 = sshll.u32 %s1363_s18, 4  ;;  %s86_s21 = sshll.u32 %s1364_s20, 4  ;;  %s75_s19 = int_to_ptr.vmem [resolvable:$true] %s74_s19  ;;  %s87_s21 = int_to_ptr.vmem [resolvable:$true] %s86_s21 }
  0x2f   :  { %s1295_s0 = scalar_lea.vmem %s75_s19, 2048  ;;  %p1300_p7 = scmp.lt.s32.totalorder %s75_s19, %s75_s19 }
  0x30   :  { %p1296_p6 = scmp.ne.s32.totalorder %s75_s19, %s1295_s0  ;;  %p1301_p8 = scmp.lt.s32.totalorder %s1295_s0, %s1295_s0 }
  0x32   :  { %p1302_p9 = por %p1301_p8, %p1300_p7 }
  0x34   :  { %p1303_p10 = pnand %p1302_p9, %p1296_p6 }
  0x36   :  { %1306 = shalt.err (!%p1303_p10)
}
  0x37   :  { %80 = dma.hbm_to_vmem [thread:$0]  %s1583_s4, 2048, %s75_s19, [#allocation9], %s1359_s22, %s1359_s22, %s1360_s23  }
  0x38   :  { %s1315_s2 = scalar_lea.vmem %s87_s21, 2048  ;;  %p1320_p12 = scmp.lt.s32.totalorder %s87_s21, %s87_s21 }
  0x39   :  { %p1316_p11 = scmp.ne.s32.totalorder %s87_s21, %s1315_s2  ;;  %p1321_p13 = scmp.lt.s32.totalorder %s1315_s2, %s1315_s2 }
  0x3b   :  { %p1322_p0 = por %p1321_p13, %p1320_p12 }
  0x3d   :  { %p1323_p1 = pnand %p1322_p0, %p1316_p11 }
  0x3f   :  { %1326 = shalt.err (!%p1323_p1)
}
  0x40   :  { %92 = dma.hbm_to_vmem [thread:$0]  %s1584_s5, 2048, %s87_s21, [#allocation12], %s1359_s22, %s1359_s22, %s1360_s23  }
  0x41   :  { %1347 = dma.done.wait [#allocation3], 1024  }
  0x42   :  { %1348 = vsyncadd [#allocation3], 4294966272 }
  0x43   :  { %1349 = dma.done.wait [#allocation6], 4096  }
  0x44   :  { %1350 = vsyncadd [#allocation6], 4294963200 }
  0x45   :  { %1351 = dma.done.wait [#allocation9], 4096  }
  0x46   :  { %1352 = vsyncadd [#allocation9], 4294963200 }
  0x47   :  { %1353 = dma.done.wait [#allocation12], 2048  }
  0x48   :  { %1354 = vsyncadd [#allocation12], 4294965248  ;;  %v144_v0 = vld [vmem:[#allocation5 + $0x78] sm:$0xff]  ;;  %v143_v1 = vld [vmem:[#allocation5 + $0x70] sm:$0xff]  ;;  %s1365_s13 = smov [#allocation13]  }
  0x49   :  { %946 = vmatprep.subr.mxu0 %v144_v0  ;;  %v142_v2 = vld [vmem:[#allocation5 + $0x68] sm:$0xff]  ;;  %v141_v3 = vld [vmem:[#allocation5 + $0x60] sm:$0xff]  ;;  %v140_v5 = vld [vmem:[#allocation5 + $0x58] sm:$0xff] }
  0x4a   :  { %947 = vmatpush3.msra.mxu0 %v144_v0  ;;  %v1462_v4 = vld [vmem:[#allocation2] sm:$0xff]  ;;  %v139_v6 = vld [vmem:[#allocation5 + $0x50] sm:$0xff]  ;;  %v280_v7 = vld [vmem:[#allocation7 + $0x78] sm:$0xff] }
  0x4b   :  { %948 = vmatprep.subr.mxu0 %v143_v1  ;;  %978 = vmatprep.mubr.f32.mxu0 %v1462_v4  ;;  %v279_v8 = vld [vmem:[#allocation7 + $0x70] sm:$0xff]  ;;  %v138_v9 = vld [vmem:[#allocation5 + $0x48] sm:$0xff]  ;;  %v137_v11 = vld [vmem:[#allocation5 + $0x40] sm:$0xff] }
  0x4c   :  { %949 = vmatpush3.msra.mxu0 %v143_v1  ;;  %990 = vmatprep.subr.mxu1 %v280_v7  ;;  %v278_v10 = vld [vmem:[#allocation7 + $0x68] sm:$0xff]  ;;  %v277_v12 = vld [vmem:[#allocation7 + $0x60] sm:$0xff]  ;;  %v136_v13 = vld [vmem:[#allocation5 + $0x38] sm:$0xff] }
  0x4d   :  { %950 = vmatprep.subr.mxu0 %v142_v2  ;;  %991 = vmatpush3.msra.mxu1 %v280_v7  ;;  %v276_v14 = vld [vmem:[#allocation7 + $0x58] sm:$0xff]  ;;  %v135_v15 = vld [vmem:[#allocation5 + $0x30] sm:$0xff]  ;;  %v134_v17 = vld [vmem:[#allocation5 + $0x28] sm:$0xff] }
  0x4e   :  { %951 = vmatpush3.msra.mxu0 %v142_v2  ;;  %992 = vmatprep.subr.mxu1 %v279_v8  ;;  %v275_v16 = vld [vmem:[#allocation7 + $0x50] sm:$0xff]  ;;  %v274_v18 = vld [vmem:[#allocation7 + $0x48] sm:$0xff]  ;;  %v133_v19 = vld [vmem:[#allocation5 + $0x20] sm:$0xff] }
  0x4f   :  { %952 = vmatprep.subr.mxu0 %v141_v3  ;;  %993 = vmatpush3.msra.mxu1 %v279_v8  ;;  %v273_v20 = vld [vmem:[#allocation7 + $0x40] sm:$0xff]  ;;  %v132_v21 = vld [vmem:[#allocation5 + $0x18] sm:$0xff]  ;;  %v131_v23 = vld [vmem:[#allocation5 + $0x10] sm:$0xff] }
  0x50   :  { %953 = vmatpush3.msra.mxu0 %v141_v3  ;;  %994 = vmatprep.subr.mxu1 %v278_v10  ;;  %v272_v22 = vld [vmem:[#allocation7 + $0x38] sm:$0xff]  ;;  %v271_v24 = vld [vmem:[#allocation7 + $0x30] sm:$0xff]  ;;  %v130_v25 = vld [vmem:[#allocation5 + $0x8] sm:$0xff] }
  0x51   :  { %954 = vmatprep.subr.mxu0 %v140_v5  ;;  %995 = vmatpush3.msra.mxu1 %v278_v10  ;;  %v270_v26 = vld [vmem:[#allocation7 + $0x28] sm:$0xff]  ;;  %v129_v27 = vld [vmem:[#allocation5] sm:$0xff]  ;;  %v1467_v30 = vld [vmem:[#allocation2 + $0x10] sm:$0xff] }
  0x52   :  { %955 = vmatpush3.msra.mxu0 %v140_v5  ;;  %996 = vmatprep.subr.mxu1 %v277_v12  ;;  %v269_v28 = vld [vmem:[#allocation7 + $0x20] sm:$0xff]  ;;  %v1465_v29 = vld [vmem:[#allocation2 + $0x8] sm:$0xff]  ;;  %v1471_v31 = vld [vmem:[#allocation2 + $0x18] sm:$0xff] }
  0x53   :  { %956 = vmatprep.subr.mxu0 %v139_v6  ;;  %997 = vmatpush3.msra.mxu1 %v277_v12  ;;  %v1473_v32 = vld [vmem:[#allocation2 + $0x20] sm:$0xff]  ;;  %v1477_v33 = vld [vmem:[#allocation2 + $0x28] sm:$0xff]  ;;  %v1479_v34 = vld [vmem:[#allocation2 + $0x30] sm:$0xff] }
  0x54   :  { %957 = vmatpush3.msra.mxu0 %v139_v6  ;;  %998 = vmatprep.subr.mxu1 %v276_v14  ;;  %v1483_v35 = vld [vmem:[#allocation2 + $0x38] sm:$0xff]  ;;  %v267_v37 = vld [vmem:[#allocation7 + $0x10] sm:$0xff]  ;;  %v266_v38 = vld [vmem:[#allocation7 + $0x8] sm:$0xff] }
  0x55   :  { %958 = vmatprep.subr.mxu0 %v138_v9  ;;  %999 = vmatpush3.msra.mxu1 %v276_v14  ;;  %v268_v36 = vld [vmem:[#allocation7 + $0x18] sm:$0xff]  ;;  %v265_v39 = vld [vmem:[#allocation7] sm:$0xff]  ;;  %v415_v41 = vld [vmem:[#allocation8 + $0x70] sm:$0xff] }
  0x56   :  { %959 = vmatpush3.msra.mxu0 %v138_v9  ;;  %1000 = vmatprep.subr.mxu1 %v275_v16  ;;  %v416_v40 = vld [vmem:[#allocation8 + $0x78] sm:$0xff]  ;;  %v414_v42 = vld [vmem:[#allocation8 + $0x68] sm:$0xff]  ;;  %v413_v43 = vld [vmem:[#allocation8 + $0x60] sm:$0xff] }
  0x57   :  { %960 = vmatprep.subr.mxu0 %v137_v11  ;;  %1001 = vmatpush3.msra.mxu1 %v275_v16  ;;  %v412_v44 = vld [vmem:[#allocation8 + $0x58] sm:$0xff]  ;;  %v411_v45 = vld [vmem:[#allocation8 + $0x50] sm:$0xff]  ;;  %v410_v46 = vld [vmem:[#allocation8 + $0x48] sm:$0xff] }
  0x58   :  { %961 = vmatpush3.msra.mxu0 %v137_v11  ;;  %1002 = vmatprep.subr.mxu1 %v274_v18  ;;  %v409_v47 = vld [vmem:[#allocation8 + $0x40] sm:$0xff]  ;;  %v408_v48 = vld [vmem:[#allocation8 + $0x38] sm:$0xff]  ;;  %v407_v49 = vld [vmem:[#allocation8 + $0x30] sm:$0xff] }
  0x59   :  { %962 = vmatprep.subr.mxu0 %v136_v13  ;;  %1003 = vmatpush3.msra.mxu1 %v274_v18  ;;  %v406_v50 = vld [vmem:[#allocation8 + $0x28] sm:$0xff]  ;;  %v405_v51 = vld [vmem:[#allocation8 + $0x20] sm:$0xff]  ;;  %v403_v14 = vld [vmem:[#allocation8 + $0x10] sm:$0xff] }
  0x5a   :  { %963 = vmatpush3.msra.mxu0 %v136_v13  ;;  %1004 = vmatprep.subr.mxu1 %v273_v20  ;;  %v821_v52 = vld [vmem:[%s1585_s6] ss:$0 sm:$0xff]  ;;  %v404_v13 = vld [vmem:[#allocation8 + $0x18] sm:$0xff]  ;;  %v543_v18 = vld [vmem:[#allocation10 + $0x70] sm:$0xff] }
  0x5b   :  { %964 = vmatprep.subr.mxu0 %v135_v15  ;;  %1005 = vmatpush3.msra.mxu1 %v273_v20  ;;  %v401_v16 = vld [vmem:[#allocation8] sm:$0xff] }
  0x5c   :  { %965 = vmatpush3.msra.mxu0 %v135_v15  ;;  %1006 = vmatprep.subr.mxu1 %v272_v22  ;;  %v402_v15 = vld [vmem:[#allocation8 + $0x8] sm:$0xff]  ;;  %v541_v20 = vld [vmem:[#allocation10 + $0x60] sm:$0xff] }
  0x5d   :  { %966 = vmatprep.subr.mxu0 %v134_v17  ;;  %1007 = vmatpush3.msra.mxu1 %v272_v22  ;;  %v539_v22 = vld [vmem:[#allocation10 + $0x50] sm:$0xff] }
  0x5e   :  { %967 = vmatpush3.msra.mxu0 %v134_v17  ;;  %1008 = vmatprep.subr.mxu1 %v271_v24  ;;  %v544_v17 = vld [vmem:[#allocation10 + $0x78] sm:$0xff] }
  0x5f   :  { %968 = vmatprep.subr.mxu0 %v133_v19  ;;  %1009 = vmatpush3.msra.mxu1 %v271_v24  ;;  %v537_v24 = vld [vmem:[#allocation10 + $0x40] sm:$0xff] }
  0x60   :  { %969 = vmatpush3.msra.mxu0 %v133_v19  ;;  %1010 = vmatprep.subr.mxu1 %v270_v26  ;;  %v542_v19 = vld [vmem:[#allocation10 + $0x68] sm:$0xff] }
  0x61   :  { %970 = vmatprep.subr.mxu0 %v132_v21  ;;  %1011 = vmatpush3.msra.mxu1 %v270_v26  ;;  %v535_v26 = vld [vmem:[#allocation10 + $0x30] sm:$0xff] }
  0x62   :  { %971 = vmatpush3.msra.mxu0 %v132_v21  ;;  %1012 = vmatprep.subr.mxu1 %v269_v28  ;;  %v540_v21 = vld [vmem:[#allocation10 + $0x58] sm:$0xff] }
  0x63   :  { %972 = vmatprep.subr.mxu0 %v131_v23  ;;  %1013 = vmatpush3.msra.mxu1 %v269_v28  ;;  %v533_v28 = vld [vmem:[#allocation10 + $0x20] sm:$0xff] }
  0x64   :  { %973 = vmatpush3.msra.mxu0 %v131_v23  ;;  %1014 = vmatprep.subr.mxu1 %v268_v36  ;;  %v538_v23 = vld [vmem:[#allocation10 + $0x48] sm:$0xff] }
  0x65   :  { %974 = vmatprep.subr.mxu0 %v130_v25  ;;  %1015 = vmatpush3.msra.mxu1 %v268_v36 }
  0x66   :  { %975 = vmatpush3.msra.mxu0 %v130_v25  ;;  %1016 = vmatprep.subr.mxu1 %v267_v37  ;;  %v536_v25 = vld [vmem:[#allocation10 + $0x38] sm:$0xff] }
  0x67   :  { %976 = vmatprep.subr.mxu0 %v129_v27  ;;  %1017 = vmatpush3.msra.mxu1 %v267_v37 }
  0x68   :  { %977 = vmatpush3.msra.mxu0 %v129_v27  ;;  %1018 = vmatprep.subr.mxu1 %v266_v38  ;;  %v534_v27 = vld [vmem:[#allocation10 + $0x28] sm:$0xff] }
  0x69   :  { %979 = vmatmul.mubr.f32.vlgmr.msra.gmra.mxu0 %v1465_v29  ;;  %1019 = vmatpush3.msra.mxu1 %v266_v38 }
  0x6a   :  { %981 = vmatprep.mubr.f32.mxu0 %v1467_v30  ;;  %1020 = vmatprep.subr.mxu1 %v265_v39 }
  0x6b   :  { %1021 = vmatpush3.msra.mxu1 %v265_v39  ;;  %1034 = vmatprep.subr.mxu0 %v416_v40 }
  0x6c   :  { %1035 = vmatpush3.msra.mxu0 %v416_v40  ;;  %1078 = vmatprep.subr.mxu1 %v544_v17 }
  0x6d   :  { %982 = vmatmul.mubr.f32.gmra.mxu0 %v1471_v31  ;;  %1036 = vmatprep.subr.mxu0 %v415_v41 }
  0x6e   :  { %984 = vmatprep.mubr.f32.mxu0 %v1473_v32  ;;  %1037 = vmatpush3.msra.mxu0 %v415_v41 }
  0x6f   :  { %1038 = vmatprep.subr.mxu0 %v414_v42 }
  0x70   :  { %1039 = vmatpush3.msra.mxu0 %v414_v42 }
  0x71   :  { %985 = vmatmul.mubr.f32.gmra.mxu0 %v1477_v33  ;;  %1040 = vmatprep.subr.mxu0 %v413_v43 }
  0x72   :  { %987 = vmatprep.mubr.f32.mxu0 %v1479_v34  ;;  %1041 = vmatpush3.msra.mxu0 %v413_v43 }
  0x73   :  { %1042 = vmatprep.subr.mxu0 %v412_v44 }
  0x74   :  { %1043 = vmatpush3.msra.mxu0 %v412_v44 }
  0x75   :  { %988 = vmatmul.mubr.f32.gmra.mxu0 %v1483_v35  ;;  %1044 = vmatprep.subr.mxu0 %v411_v45 }
  0x76   :  { %1045 = vmatpush3.msra.mxu0 %v411_v45 }
  0x77   :  { %1046 = vmatprep.subr.mxu0 %v410_v46 }
  0x78   :  { %1047 = vmatpush3.msra.mxu0 %v410_v46 }
  0x79   :  { %1048 = vmatprep.subr.mxu0 %v409_v47 }
  0x7a   :  { %1049 = vmatpush3.msra.mxu0 %v409_v47 }
  0x7b   :  { %1050 = vmatprep.subr.mxu0 %v408_v48 }
  0x7c   :  { %1051 = vmatpush3.msra.mxu0 %v408_v48 }
  0x7d   :  { %1052 = vmatprep.subr.mxu0 %v407_v49 }
  0x7e   :  { %1053 = vmatpush3.msra.mxu0 %v407_v49 }
  0x7f   :  { %1054 = vmatprep.subr.mxu0 %v406_v50 }
  0x80   :  { %1055 = vmatpush3.msra.mxu0 %v406_v50 }
  0x81   :  { %1056 = vmatprep.subr.mxu0 %v405_v51 }
  0x82   :  { %1057 = vmatpush3.msra.mxu0 %v405_v51 }
  0x83   :  { %1058 = vmatprep.subr.mxu0 %v404_v13 }
  0x84   :  { %1059 = vmatpush3.msra.mxu0 %v404_v13 }
  0x85   :  { %1060 = vmatprep.subr.mxu0 %v403_v14 }
  0x86   :  { %1061 = vmatpush3.msra.mxu0 %v403_v14 }
  0x87   :  { %1062 = vmatprep.subr.mxu0 %v402_v15 }
  0x88   :  { %1063 = vmatpush3.msra.mxu0 %v402_v15 }
  0x89   :  { %1064 = vmatprep.subr.mxu0 %v401_v16 }
  0x8a   :  { %1065 = vmatpush3.msra.mxu0 %v401_v16 }
 0x129   :  { %v980_v53 = vpop.f32.mrf.mxu0 }
 0x12a   :  { %v224_v54 = vadd.f32 %v980_v53, %v821_v52 }
 0x12b   :  { %v218_v55 = vpop.f32.mrf.mxu0 }
 0x12c   :  { %v219_v56 = vadd.f32 %v821_v52, %v218_v55  ;;  %v1493_v59 = vadd.f32 %v224_v54, %v1465_v29  ;;  %v532_v29 = vld [vmem:[#allocation10 + $0x18] sm:$0xff]  ;;  %v531_v55 = vld [vmem:[#allocation10 + $0x10] sm:$0xff] }
 0x12d   :  { %v983_v57 = vpop.f32.mrf.mxu0 }
 0x12e   :  { %v1490_v58 = vadd.f32 %v219_v56, %v1462_v4  ;;  %v234_v60 = vadd.f32 %v983_v57, %v821_v52  ;;  %v530_v56 = vld [vmem:[#allocation10 + $0x8] sm:$0xff]  ;;  %v529_v57 = vld [vmem:[#allocation10] sm:$0xff] }
 0x12f   :  { %v228_v61 = vpop.f32.mrf.mxu0 }
 0x130   :  { %v229_v62 = vadd.f32 %v821_v52, %v228_v61  ;;  %1022 = vmatprep.mubr.f32.mxu1 %v1490_v58  ;;  %v1501_v1 = vadd.f32 %v234_v60, %v1471_v31  ;;  %v678_v60 = vld [vmem:[#allocation11 + $0x68] sm:$0xff]  ;;  %v677_v61 = vld [vmem:[#allocation11 + $0x60] sm:$0xff] }
 0x131   :  { %v986_v63 = vpop.f32.mrf.mxu0  ;;  %1023 = vmatmul.mubr.f32.vlgmr.msra.gmra.mxu1 %v1493_v59 }
 0x132   :  { %v1498_v0 = vadd.f32 %v229_v62, %v1467_v30  ;;  %v244_v2 = vadd.f32 %v986_v63, %v821_v52  ;;  %1079 = vmatpush3.msra.mxu1 %v544_v17  ;;  %v822_v30 = vld [vmem:[%s1586_s7] ss:$0 sm:$0xff]  ;;  %v676_v62 = vld [vmem:[#allocation11 + $0x58] sm:$0xff]  ;;  %v675_v63 = vld [vmem:[#allocation11 + $0x50] sm:$0xff] }
 0x133   :  { %v238_v3 = vpop.f32.mrf.mxu0  ;;  %1080 = vmatprep.subr.mxu1 %v543_v18 }
 0x134   :  { %v239_v4 = vadd.f32 %v821_v52, %v238_v3  ;;  %1025 = vmatprep.mubr.f32.mxu1 %v1498_v0  ;;  %v1509_v7 = vadd.f32 %v244_v2, %v1477_v33  ;;  %1081 = vmatpush3.msra.mxu1 %v543_v18  ;;  %v672_v2 = vld [vmem:[#allocation11 + $0x38] sm:$0xff]  ;;  %v671_v3 = vld [vmem:[#allocation11 + $0x30] sm:$0xff] }
 0x135   :  { %v989_v5 = vpop.f32.mrf.mxu0  ;;  %1026 = vmatmul.mubr.f32.gmra.mxu1 %v1501_v1  ;;  %1082 = vmatprep.subr.mxu1 %v542_v19 }
 0x136   :  { %v1506_v6 = vadd.f32 %v239_v4, %v1473_v32  ;;  %v254_v8 = vadd.f32 %v989_v5, %v821_v52  ;;  %1083 = vmatpush3.msra.mxu1 %v542_v19  ;;  %v670_v4 = vld [vmem:[#allocation11 + $0x28] sm:$0xff]  ;;  %v669_v5 = vld [vmem:[#allocation11 + $0x20] sm:$0xff] }
 0x137   :  { %v248_v9 = vpop.f32.mrf.mxu0  ;;  %1084 = vmatprep.subr.mxu1 %v541_v20 }
 0x138   :  { %v249_v10 = vadd.f32 %v821_v52, %v248_v9  ;;  %1028 = vmatprep.mubr.f32.mxu1 %v1506_v6  ;;  %v1517_v12 = vadd.f32 %v254_v8, %v1483_v35  ;;  %1085 = vmatpush3.msra.mxu1 %v541_v20 }
 0x139   :  { %1029 = vmatmul.mubr.f32.gmra.mxu1 %v1509_v7  ;;  %1086 = vmatprep.subr.mxu1 %v540_v21 }
 0x13a   :  { %v1514_v11 = vadd.f32 %v249_v10, %v1479_v34  ;;  %1087 = vmatpush3.msra.mxu1 %v540_v21 }
 0x13b   :  { %1088 = vmatprep.subr.mxu1 %v539_v22 }
 0x13c   :  { %1031 = vmatprep.mubr.f32.mxu1 %v1514_v11  ;;  %1089 = vmatpush3.msra.mxu1 %v539_v22 }
 0x13d   :  { %1032 = vmatmul.mubr.f32.gmra.mxu1 %v1517_v12  ;;  %1090 = vmatprep.subr.mxu1 %v538_v23 }
 0x13e   :  { %1091 = vmatpush3.msra.mxu1 %v538_v23  ;;  %v668_v23 = vld [vmem:[#allocation11 + $0x18] sm:$0xff] }
 0x13f   :  { %1092 = vmatprep.subr.mxu1 %v537_v24 }
 0x140   :  { %1093 = vmatpush3.msra.mxu1 %v537_v24  ;;  %v667_v24 = vld [vmem:[#allocation11 + $0x10] sm:$0xff] }
 0x141   :  { %1094 = vmatprep.subr.mxu1 %v536_v25 }
 0x142   :  { %1095 = vmatpush3.msra.mxu1 %v536_v25  ;;  %v666_v25 = vld [vmem:[#allocation11 + $0x8] sm:$0xff] }
 0x143   :  { %1096 = vmatprep.subr.mxu1 %v535_v26 }
 0x144   :  { %1097 = vmatpush3.msra.mxu1 %v535_v26  ;;  %v665_v26 = vld [vmem:[#allocation11] sm:$0xff] }
 0x145   :  { %1098 = vmatprep.subr.mxu1 %v534_v27 }
 0x146   :  { %1099 = vmatpush3.msra.mxu1 %v534_v27  ;;  %v824_v27 = vld [vmem:[%s1588_s9] ss:$0 sm:$0xff] }
 0x147   :  { %1100 = vmatprep.subr.mxu1 %v533_v28 }
 0x148   :  { %1101 = vmatpush3.msra.mxu1 %v533_v28 }
 0x149   :  { %1102 = vmatprep.subr.mxu1 %v532_v29 }
 0x14a   :  { %1103 = vmatpush3.msra.mxu1 %v532_v29 }
 0x14b   :  { %1104 = vmatprep.subr.mxu1 %v531_v55 }
 0x14c   :  { %1105 = vmatpush3.msra.mxu1 %v531_v55 }
 0x14d   :  { %1106 = vmatprep.subr.mxu1 %v530_v56 }
 0x14e   :  { %1107 = vmatpush3.msra.mxu1 %v530_v56 }
 0x14f   :  { %1108 = vmatprep.subr.mxu1 %v529_v57 }
 0x150   :  { %1109 = vmatpush3.msra.mxu1 %v529_v57 }
 0x1f1   :  { %v1024_v31 = vpop.f32.mrf.mxu1 }
 0x1f2   :  { %v360_v32 = vadd.f32 %v1024_v31, %v822_v30 }
 0x1f3   :  { %v354_v33 = vpop.f32.mrf.mxu1 }
 0x1f4   :  { %v355_v34 = vadd.f32 %v822_v30, %v354_v33  ;;  %v394_v37 = vadd.f32 %v360_v32, %v1493_v59  ;;  %v679_v59 = vld [vmem:[#allocation11 + $0x70] sm:$0xff] }
 0x1f5   :  { %v1027_v35 = vpop.f32.mrf.mxu1 }
 0x1f6   :  { %v393_v36 = vadd.f32 %v355_v34, %v1490_v58  ;;  %v370_v38 = vadd.f32 %v1027_v35, %v822_v30  ;;  %v680_v58 = vld [vmem:[#allocation11 + $0x78] sm:$0xff] }
 0x1f7   :  { %v364_v39 = vpop.f32.mrf.mxu1  ;;  %1122 = vmatprep.subr.mxu0 %v680_v58  ;;  %1166 = vmatprep.subr.mxu1 %v680_v58 }
 0x1f8   :  { %v365_v40 = vadd.f32 %v822_v30, %v364_v39  ;;  %1066 = vmatprep.mubr.f32.mxu0 %v393_v36  ;;  %v396_v43 = vadd.f32 %v370_v38, %v1501_v1  ;;  %v673_v1 = vld [vmem:[#allocation11 + $0x40] sm:$0xff] }
 0x1f9   :  { %v1030_v41 = vpop.f32.mrf.mxu1  ;;  %1067 = vmatmul.mubr.f32.vlgmr.msra.gmra.mxu0 %v394_v37 }
 0x1fa   :  { %v395_v42 = vadd.f32 %v365_v40, %v1498_v0  ;;  %v380_v44 = vadd.f32 %v1030_v41, %v822_v30  ;;  %1123 = vmatpush3.msra.mxu0 %v680_v58  ;;  %v674_v0 = vld [vmem:[#allocation11 + $0x48] sm:$0xff] }
 0x1fb   :  { %v374_v45 = vpop.f32.mrf.mxu1  ;;  %1124 = vmatprep.subr.mxu0 %v679_v59 }
 0x1fc   :  { %v375_v46 = vadd.f32 %v822_v30, %v374_v45  ;;  %1069 = vmatprep.mubr.f32.mxu0 %v395_v42  ;;  %v398_v49 = vadd.f32 %v380_v44, %v1509_v7  ;;  %1125 = vmatpush3.msra.mxu0 %v679_v59  ;;  %v823_v7 = vld [vmem:[%s1587_s8] ss:$0 sm:$0xff] }
 0x1fd   :  { %v1033_v47 = vpop.f32.mrf.mxu1  ;;  %1070 = vmatmul.mubr.f32.gmra.mxu0 %v396_v43  ;;  %1126 = vmatprep.subr.mxu0 %v678_v60 }
 0x1fe   :  { %v397_v48 = vadd.f32 %v375_v46, %v1506_v6  ;;  %v390_v50 = vadd.f32 %v1033_v47, %v822_v30  ;;  %1127 = vmatpush3.msra.mxu0 %v678_v60 }
 0x1ff   :  { %v384_v51 = vpop.f32.mrf.mxu1  ;;  %1128 = vmatprep.subr.mxu0 %v677_v61 }
 0x200   :  { %v385_v52 = vadd.f32 %v822_v30, %v384_v51  ;;  %1072 = vmatprep.mubr.f32.mxu0 %v397_v48  ;;  %v400_v54 = vadd.f32 %v390_v50, %v1517_v12  ;;  %1129 = vmatpush3.msra.mxu0 %v677_v61 }
 0x201   :  { %1073 = vmatmul.mubr.f32.gmra.mxu0 %v398_v49  ;;  %1130 = vmatprep.subr.mxu0 %v676_v62 }
 0x202   :  { %v399_v53 = vadd.f32 %v385_v52, %v1514_v11  ;;  %1131 = vmatpush3.msra.mxu0 %v676_v62  ;;  %v825_v52 = vld [vmem:[%s1589_s10] ss:$0 sm:$0xff]  ;;  %s806_s10 = sshll.u32 %s1365_s13, 4  ;;  %s807_s10 = int_to_ptr.vmem [resolvable:$true] %s806_s10 }
 0x203   :  { %1132 = vmatprep.subr.mxu0 %v675_v63  ;;  %s1327_s1 = scalar_lea.vmem %s807_s10, 1024  ;;  %p1332_p3 = scmp.lt.s32.totalorder %s807_s10, %s807_s10 }
 0x204   :  { %1075 = vmatprep.mubr.f32.mxu0 %v399_v53  ;;  %1133 = vmatpush3.msra.mxu0 %v675_v63  ;;  %p1328_p2 = scmp.ne.s32.totalorder %s807_s10, %s1327_s1  ;;  %p1333_p4 = scmp.lt.s32.totalorder %s1327_s1, %s1327_s1 }
 0x205   :  { %1076 = vmatmul.mubr.f32.gmra.mxu0 %v400_v54  ;;  %1134 = vmatprep.subr.mxu0 %v674_v0 }
 0x206   :  { %1135 = vmatpush3.msra.mxu0 %v674_v0  ;;  %p1334_p5 = por %p1333_p4, %p1332_p3 }
 0x207   :  { %1136 = vmatprep.subr.mxu0 %v673_v1 }
 0x208   :  { %1137 = vmatpush3.msra.mxu0 %v673_v1  ;;  %p1335_p6 = pnand %p1334_p5, %p1328_p2 }
 0x209   :  { %1138 = vmatprep.subr.mxu0 %v672_v2 }
 0x20a   :  { %1139 = vmatpush3.msra.mxu0 %v672_v2 }
 0x20b   :  { %1140 = vmatprep.subr.mxu0 %v671_v3 }
 0x20c   :  { %1141 = vmatpush3.msra.mxu0 %v671_v3 }
 0x20d   :  { %1142 = vmatprep.subr.mxu0 %v670_v4 }
 0x20e   :  { %1143 = vmatpush3.msra.mxu0 %v670_v4 }
 0x20f   :  { %1144 = vmatprep.subr.mxu0 %v669_v5 }
 0x210   :  { %1145 = vmatpush3.msra.mxu0 %v669_v5 }
 0x211   :  { %1146 = vmatprep.subr.mxu0 %v668_v23 }
 0x212   :  { %1147 = vmatpush3.msra.mxu0 %v668_v23 }
 0x213   :  { %1148 = vmatprep.subr.mxu0 %v667_v24 }
 0x214   :  { %1149 = vmatpush3.msra.mxu0 %v667_v24 }
 0x215   :  { %1150 = vmatprep.subr.mxu0 %v666_v25 }
 0x216   :  { %1151 = vmatpush3.msra.mxu0 %v666_v25 }
 0x217   :  { %1152 = vmatprep.subr.mxu0 %v665_v26 }
 0x218   :  { %1153 = vmatpush3.msra.mxu0 %v665_v26 }
 0x2b9   :  { %v1068_v6 = vpop.f32.mrf.mxu0 }
 0x2ba   :  { %v1537_v10 = vadd.f32 %v1068_v6, %v823_v7 }
 0x2bb   :  { %v490_v8 = vpop.f32.mrf.mxu0 }
 0x2bc   :  { %v1535_v9 = vadd.f32 %v823_v7, %v490_v8 }
 0x2bd   :  { %v1071_v11 = vpop.f32.mrf.mxu0 }
 0x2be   :  { %1110 = vmatprep.mubr.f32.mxu1 %v1535_v9  ;;  %v1543_v14 = vadd.f32 %v1071_v11, %v823_v7 }
 0x2bf   :  { %v500_v12 = vpop.f32.mrf.mxu0  ;;  %1111 = vmatmul.mubr.f32.vlgmr.msra.gmra.mxu1 %v1537_v10 }
 0x2c0   :  { %v1541_v13 = vadd.f32 %v823_v7, %v500_v12  ;;  %1182 = vmatpush3.msra.mxu1 %v680_v58 }
 0x2c1   :  { %v1074_v15 = vpop.f32.mrf.mxu0  ;;  %1167 = vmatprep.subr.mxu1 %v679_v59 }
 0x2c2   :  { %1113 = vmatprep.mubr.f32.mxu1 %v1541_v13  ;;  %1183 = vmatpush3.msra.mxu1 %v679_v59  ;;  %v1549_v18 = vadd.f32 %v1074_v15, %v823_v7 }
 0x2c3   :  { %v510_v16 = vpop.f32.mrf.mxu0  ;;  %1114 = vmatmul.mubr.f32.gmra.mxu1 %v1543_v14  ;;  %1168 = vmatprep.subr.mxu1 %v678_v60 }
 0x2c4   :  { %v1547_v17 = vadd.f32 %v823_v7, %v510_v16  ;;  %1184 = vmatpush3.msra.mxu1 %v678_v60 }
 0x2c5   :  { %v1077_v19 = vpop.f32.mrf.mxu0  ;;  %1169 = vmatprep.subr.mxu1 %v677_v61 }
 0x2c6   :  { %1116 = vmatprep.mubr.f32.mxu1 %v1547_v17  ;;  %1185 = vmatpush3.msra.mxu1 %v677_v61  ;;  %v1555_v22 = vadd.f32 %v1077_v19, %v823_v7 }
 0x2c7   :  { %v520_v20 = vpop.f32.mrf.mxu0  ;;  %1117 = vmatmul.mubr.f32.gmra.mxu1 %v1549_v18  ;;  %1170 = vmatprep.subr.mxu1 %v676_v62 }
 0x2c8   :  { %v1553_v21 = vadd.f32 %v823_v7, %v520_v20  ;;  %1186 = vmatpush3.msra.mxu1 %v676_v62 }
 0x2c9   :  { %1171 = vmatprep.subr.mxu1 %v675_v63 }
 0x2ca   :  { %1119 = vmatprep.mubr.f32.mxu1 %v1553_v21  ;;  %1187 = vmatpush3.msra.mxu1 %v675_v63 }
 0x2cb   :  { %1120 = vmatmul.mubr.f32.gmra.mxu1 %v1555_v22  ;;  %1172 = vmatprep.subr.mxu1 %v674_v0 }
 0x2cc   :  { %1188 = vmatpush3.msra.mxu1 %v674_v0 }
 0x2cd   :  { %1173 = vmatprep.subr.mxu1 %v673_v1 }
 0x2ce   :  { %1189 = vmatpush3.msra.mxu1 %v673_v1 }
 0x2cf   :  { %1174 = vmatprep.subr.mxu1 %v672_v2 }
 0x2d0   :  { %1190 = vmatpush3.msra.mxu1 %v672_v2 }
 0x2d1   :  { %1175 = vmatprep.subr.mxu1 %v671_v3 }
 0x2d2   :  { %1191 = vmatpush3.msra.mxu1 %v671_v3 }
 0x2d3   :  { %1176 = vmatprep.subr.mxu1 %v670_v4 }
 0x2d4   :  { %1192 = vmatpush3.msra.mxu1 %v670_v4 }
 0x2d5   :  { %1177 = vmatprep.subr.mxu1 %v669_v5 }
 0x2d6   :  { %1193 = vmatpush3.msra.mxu1 %v669_v5 }
 0x2d7   :  { %1178 = vmatprep.subr.mxu1 %v668_v23 }
 0x2d8   :  { %1194 = vmatpush3.msra.mxu1 %v668_v23 }
 0x2d9   :  { %1179 = vmatprep.subr.mxu1 %v667_v24 }
 0x2da   :  { %1195 = vmatpush3.msra.mxu1 %v667_v24 }
 0x2db   :  { %1180 = vmatprep.subr.mxu1 %v666_v25 }
 0x2dc   :  { %1196 = vmatpush3.msra.mxu1 %v666_v25 }
 0x2dd   :  { %1181 = vmatprep.subr.mxu1 %v665_v26 }
 0x2de   :  { %1197 = vmatpush3.msra.mxu1 %v665_v26 }
 0x37f   :  { %v1112_v28 = vpop.f32.mrf.mxu1 }
 0x380   :  { %v624_v29 = vadd.f32 %v1112_v28, %v824_v27 }
 0x381   :  { %v618_v30 = vpop.f32.mrf.mxu1 }
 0x382   :  { %v619_v31 = vadd.f32 %v824_v27, %v618_v30  ;;  %v658_v34 = vadd.f32 %v624_v29, %v1537_v10 }
 0x383   :  { %v1115_v32 = vpop.f32.mrf.mxu1 }
 0x384   :  { %v657_v33 = vadd.f32 %v619_v31, %v1535_v9  ;;  %v634_v35 = vadd.f32 %v1115_v32, %v824_v27 }
 0x385   :  { %v628_v36 = vpop.f32.mrf.mxu1 }
 0x386   :  { %v629_v37 = vadd.f32 %v824_v27, %v628_v36  ;;  %1154 = vmatprep.mubr.f32.mxu0 %v657_v33  ;;  %v660_v40 = vadd.f32 %v634_v35, %v1543_v14 }
 0x387   :  { %v1118_v38 = vpop.f32.mrf.mxu1  ;;  %1155 = vmatmul.mubr.f32.vlgmr.msra.gmra.mxu0 %v658_v34 }
 0x388   :  { %v659_v39 = vadd.f32 %v629_v37, %v1541_v13  ;;  %v644_v41 = vadd.f32 %v1118_v38, %v824_v27 }
 0x389   :  { %v638_v42 = vpop.f32.mrf.mxu1 }
 0x38a   :  { %v639_v43 = vadd.f32 %v824_v27, %v638_v42  ;;  %1157 = vmatprep.mubr.f32.mxu0 %v659_v39  ;;  %v662_v46 = vadd.f32 %v644_v41, %v1549_v18 }
 0x38b   :  { %v1121_v44 = vpop.f32.mrf.mxu1  ;;  %1158 = vmatmul.mubr.f32.gmra.mxu0 %v660_v40 }
 0x38c   :  { %v661_v45 = vadd.f32 %v639_v43, %v1547_v17  ;;  %v654_v47 = vadd.f32 %v1121_v44, %v824_v27 }
 0x38d   :  { %v648_v48 = vpop.f32.mrf.mxu1 }
 0x38e   :  { %v649_v49 = vadd.f32 %v824_v27, %v648_v48  ;;  %1160 = vmatprep.mubr.f32.mxu1 %v661_v45  ;;  %v664_v51 = vadd.f32 %v654_v47, %v1555_v22 }
 0x38f   :  { %1161 = vmatmul.mubr.f32.vlgmr.msra.gmra.mxu1 %v662_v46 }
 0x390   :  { %v663_v50 = vadd.f32 %v649_v49, %v1553_v21 }
 0x392   :  { %1163 = vmatprep.mubr.f32.mxu1 %v663_v50 }
 0x393   :  { %1164 = vmatmul.mubr.f32.gmra.mxu1 %v664_v51 }
 0x447   :  { %v1156_v53 = vpop.f32.mrf.mxu0 }
 0x448   :  { %v760_v54 = vadd.f32 %v1156_v53, %v825_v52 }
 0x449   :  { %v754_v55 = vpop.f32.mrf.mxu0 }
 0x44a   :  { %794 = vst [vmem:[#allocation13 + $0x8] sm:$0xff] %v760_v54  ;;  %v755_v56 = vadd.f32 %v825_v52, %v754_v55 }
 0x44b   :  { %v1159_v57 = vpop.f32.mrf.mxu0 }
 0x44c   :  { %793 = vst [vmem:[#allocation13] sm:$0xff] %v755_v56  ;;  %v770_v58 = vadd.f32 %v1159_v57, %v825_v52 }
 0x44d   :  { %v764_v59 = vpop.f32.mrf.mxu0 }
 0x44e   :  { %796 = vst [vmem:[#allocation13 + $0x18] sm:$0xff] %v770_v58  ;;  %v765_v60 = vadd.f32 %v825_v52, %v764_v59 }
 0x44f   :  { %v1162_v61 = vpop.f32.mrf.mxu1 }
 0x450   :  { %795 = vst [vmem:[#allocation13 + $0x10] sm:$0xff] %v765_v60  ;;  %v780_v62 = vadd.f32 %v1162_v61, %v825_v52 }
 0x451   :  { %v774_v63 = vpop.f32.mrf.mxu1 }
 0x452   :  { %798 = vst [vmem:[#allocation13 + $0x28] sm:$0xff] %v780_v62  ;;  %v775_v0 = vadd.f32 %v825_v52, %v774_v63 }
 0x453   :  { %v1165_v1 = vpop.f32.mrf.mxu1 }
 0x454   :  { %797 = vst [vmem:[#allocation13 + $0x20] sm:$0xff] %v775_v0  ;;  %v790_v2 = vadd.f32 %v1165_v1, %v825_v52 }
 0x455   :  { %v784_v3 = vpop.f32.mrf.mxu1 }
 0x456   :  { %800 = vst [vmem:[#allocation13 + $0x38] sm:$0xff] %v790_v2  ;;  %v785_v4 = vadd.f32 %v825_v52, %v784_v3 }
 0x458   :  { %799 = vst [vmem:[#allocation13 + $0x30] sm:$0xff] %v785_v4 }
 0x459   :  { %1338 = shalt.err (!%p1335_p6)
}
 0x45a   :  { %812 = dma.vmem_to_hbm [thread:$0]  %s807_s10, 1024, %s1590_s11, [#allocation4], %s1359_s22, %s1359_s22, %s1360_s23  }
 0x45b   :  { %1355 = dma.done.wait [#allocation4], 1024  }
 0x45c   :  { %1356 = vsyncadd [#allocation4], 4294966272 }
 0x45d   :  { %816 = vsyncpa [#allocation3], 1 }
 0x45e   :  { %817 = vsyncpa [#allocation6], 1 }
 0x45f   :  { %818 = vsyncpa [#allocation9], 1 }
 0x460   :  { %819 = vsyncpa [#allocation12], 1 }
 0x461   :  { %820 = vsyncpa [#allocation4], 1 }

</bundles_post_ra>
